<compile_context>
chip_gen: v6e
topology: v6e:2x2x1
jax: 0.10.0
libtpu: 0.0.40
codegen_flags: <defaults>
</compile_context>

<pallas_src>
import math
import functools

import numpy as np
import jax
import jax.numpy as jnp
from jax import lax
from jax.experimental import pallas as pl
from jax.experimental.pallas import tpu as pltpu


# --------------------------------------------------------------------------------------
# Parameter construction (host-side numpy glue) -- mirrors LeePositionController.__init__
# --------------------------------------------------------------------------------------
def compute_parameters(rotor_config, inertia_matrix):
    rotor_angles = np.asarray(rotor_config["rotor_angles"], np.float64)
    arm_lengths = np.asarray(rotor_config["arm_lengths"], np.float64)
    force_constants = np.asarray(rotor_config["force_constants"], np.float64)
    moment_constants = np.asarray(rotor_config["moment_constants"], np.float64)
    directions = np.asarray(rotor_config["directions"], np.float64)
    A = np.stack(
        [
            np.sin(rotor_angles) * arm_lengths,
            -np.cos(rotor_angles) * arm_lengths,
            -directions * moment_constants / force_constants,
            np.ones_like(rotor_angles),
        ]
    )
    mixer = A.T @ np.linalg.inv(A @ A.T) @ inertia_matrix
    return mixer


def make_params(g, uav_params, controller_params):
    # TODO(synk): the original module reads controller gains from a yaml file next to the
    # module; here they are passed in as a plain dict (no file I/O allowed in this script).
    rotor_config = uav_params["rotor_configuration"]
    inertia = uav_params["inertia"]
    force_constants = np.asarray(rotor_config["force_constants"], np.float64)
    max_rot_vel = np.asarray(rotor_config["max_rotation_velocities"], np.float64)
    max_thrusts = np.square(max_rot_vel) * force_constants                       # [4]
    I4 = np.diag([inertia["xx"], inertia["yy"], inertia["zz"], 1.0])
    mixer = compute_parameters(rotor_config, I4)                                 # [4, 4]
    I3_inv = np.linalg.inv(I4[:3, :3])
    attitude_gain = np.asarray(controller_params["attitude_gain"], np.float64) @ I3_inv
    ang_rate_gain = np.asarray(controller_params["angular_rate_gain"], np.float64) @ I3_inv
    return dict(
        pos_gain=jnp.asarray(controller_params["position_gain"], jnp.float32),
        vel_gain=jnp.asarray(controller_params["velocity_gain"], jnp.float32),
        attitude_gain=jnp.asarray(attitude_gain, jnp.float32),
        ang_rate_gain=jnp.asarray(ang_rate_gain, jnp.float32),
        mass=jnp.asarray(uav_params["mass"], jnp.float32),
        g=jnp.abs(jnp.asarray(g, jnp.float32)),
        max_thrusts=jnp.asarray(max_thrusts, jnp.float32),
        mixer=jnp.asarray(mixer, jnp.float32),
    )


# Packed SMEM parameter-vector layout (all f32):
#  [0:3]  pos_gain   [3:6]  vel_gain   [6] g (z component)
#  [7:10] attitude_gain (already * I^-1)   [10:13] ang_rate_gain (already * I^-1)
#  [13:29] folded mixer' (row-major 4x4):
#          mixer'[i, j] = mixer[i, j] * 2 / max_thrusts[i]           (j = 0..2)
#          mixer'[i, 3] = mixer[i, 3] * 2 / max_thrusts[i] * (-mass)
_NP = 29
_NF = 23   # input features per drone


def _pack_params(params):
    scale = (2.0 / params["max_thrusts"]).reshape(4, 1)
    mixer_f = params["mixer"] * scale
    mixer_f = mixer_f.at[:, 3].multiply(-params["mass"])
    vec = jnp.concatenate(
        [
            params["pos_gain"].reshape(3),
            params["vel_gain"].reshape(3),
            params["g"].reshape(1),
            params["attitude_gain"].reshape(3),
            params["ang_rate_gain"].reshape(3),
            mixer_f.reshape(16),
        ]
    ).astype(jnp.float32)
    assert vec.shape == (_NP,)
    return vec


# --------------------------------------------------------------------------------------
# Input preparation (default handling of forward(); plain JAX glue shared with reference)
# --------------------------------------------------------------------------------------
def _prepare_inputs(root_state, target_pos, target_vel, target_acc, target_yaw):
    batch_shape = root_state.shape[:-1]
    root = root_state.astype(jnp.float32)
    if target_pos is None:
        tpos = root[..., :3]
    else:
        tpos = jnp.broadcast_to(target_pos, batch_shape + (3,)).astype(jnp.float32)
    if target_vel is None:
        tvel = jnp.zeros(batch_shape + (3,), jnp.float32)
    else:
        tvel = jnp.broadcast_to(target_vel, batch_shape + (3,)).astype(jnp.float32)
    if target_acc is None:
        tacc = jnp.zeros(batch_shape + (3,), jnp.float32)
    else:
        tacc = jnp.broadcast_to(target_acc, batch_shape + (3,)).astype(jnp.float32)
    if target_yaw is None:
        q = root[..., 3:7]   # (w, x, y, z)
        yaw = jnp.arctan2(
            2.0 * (q[..., 0] * q[..., 3] + q[..., 1] * q[..., 2]),
            1.0 - 2.0 * (q[..., 2] * q[..., 2] + q[..., 3] * q[..., 3]),
        )[..., None]
    else:
        ty = target_yaw
        if ty.shape[-1] != 1:
            ty = ty[..., None]
        yaw = jnp.broadcast_to(ty, batch_shape + (1,)).astype(jnp.float32)
    return (
        batch_shape,
        root.reshape(-1, 13),
        tpos.reshape(-1, 3),
        tvel.reshape(-1, 3),
        tacc.reshape(-1, 3),
        yaw.reshape(-1, 1),
    )


# --------------------------------------------------------------------------------------
# Tiling selection
# --------------------------------------------------------------------------------------
def _cdiv(a, b):
    return -(-a // b)


def _round8(x):
    return _cdiv(x, 8) * 8


def _choose_tiling(n, max_block_rows=512, target_grid_steps=4):
    """Returns (nb, tb, steps): total 128-drone rows (padded), rows per grid step, steps."""
    nb_min = _cdiv(max(n, 1), 128)        # 128-drone lane-rows needed
    nb8 = _round8(nb_min)                 # sublane alignment (<= 896 dummy drones)
    if nb8 <= 128:                        # <= 16384 drones: one step, full-extent block
        return nb8, nb8, 1
    # >= target_grid_steps steps (v7x megacore), each step <= max_block_rows rows; tb sized
    # from the actual row count so padding stays at a few rows, not up to a whole block.
    steps = max(target_grid_steps, _cdiv(nb8, max_block_rows))
    tb = max(8, _round8(_cdiv(nb8, steps)))
    steps = _cdiv(nb8, tb)
    return steps * tb, tb, steps


# --------------------------------------------------------------------------------------
# Pallas kernel
# --------------------------------------------------------------------------------------
def _lee_kernel(x_ref, p_ref, o_ref, *, body_rate):
    # x_ref: [23, TB, 128]  feature-major tile (batch on sublanes x lanes), VMEM
    # p_ref: [29]           packed controller parameters, SMEM (scalar reads)
    # o_ref: [4,  TB, 128]  rotor commands, VMEM (lane-dense stores)
    pg0, pg1, pg2 = p_ref[0], p_ref[1], p_ref[2]
    vg0, vg1, vg2 = p_ref[3], p_ref[4], p_ref[5]
    gz = p_ref[6]
    ag0, ag1, ag2 = p_ref[7], p_ref[8], p_ref[9]
    rg0, rg1, rg2 = p_ref[10], p_ref[11], p_ref[12]
    mix = [[p_ref[13 + 4 * i + j] for j in range(4)] for i in range(4)]

    tb = x_ref.shape[1]
    n_chunks = tb // 8                      # tb is always a multiple of 8
    unroll = 2 if (n_chunks > 1 and n_chunks % 2 == 0) else 1

    def chunk(c, carry):
        # One 8-sublane chunk (8 x 128 = 1024 drones): every temporary is exactly one vreg,
        # so the ~40-value dataflow stays inside the 64-vreg register file.
        r0 = pl.multiple_of(c * 8, 8)
        sl = pl.ds(r0, 8)

        def row(i):
            return x_ref[i, sl, :]

        px, py, pz = row(0), row(1), row(2)
        qw, qx, qy, qz = row(3), row(4), row(5), row(6)
        wx, wy, wz = row(10), row(11), row(12)
        vx, vy, vz = row(7), row(8), row(9)
        tpx, tpy, tpz = row(13), row(14), row(15)
        tvx, tvy, tvz = row(16), row(17), row(18)
        tax, tay, taz = row(19), row(20), row(21)
        tyaw = row(22)

        if not body_rate:
            # quat_rotate_inverse(rot, ang_vel): v*(2w^2-1) - 2w*(qv x v) + 2*qv*(qv.v)
            t = 2.0 * qw * qw - 1.0
            cx = qy * wz - qz * wy
            cy = qz * wx - qx * wz
            cz = qx * wy - qy * wx
            d = qx * wx + qy * wy + qz * wz
            wx, wy, wz = (
                wx * t - 2.0 * qw * cx + 2.0 * qx * d,
                wy * t - 2.0 * qw * cy + 2.0 * qy * d,
                wz * t - 2.0 * qw * cz + 2.0 * qz * d,
            )

        # acc = pos_error*pos_gain + vel_error*vel_gain - g - target_acc
        acc_x = (px - tpx) * pg0 + (vx - tvx) * vg0 - tax
        acc_y = (py - tpy) * pg1 + (vy - tvy) * vg1 - tay
        acc_z = (pz - tpz) * pg2 + (vz - tvz) * vg2 - gz - taz

        # rotation matrix from quaternion (w, x, y, z)
        r00 = 1.0 - 2.0 * (qy * qy + qz * qz)
        r01 = 2.0 * (qx * qy - qw * qz)
        r02 = 2.0 * (qx * qz + qw * qy)
        r10 = 2.0 * (qx * qy + qw * qz)
        r11 = 1.0 - 2.0 * (qx * qx + qz * qz)
        r12 = 2.0 * (qy * qz - qw * qx)
        r20 = 2.0 * (qx * qz - qw * qy)
        r21 = 2.0 * (qy * qz + qw * qx)
        r22 = 1.0 - 2.0 * (qx * qx + qy * qy)

        # desired body axes (transcendentals and rsqrt go to the otherwise-idle EUP slot)
        b1x = jnp.cos(tyaw)
        b1y = jnp.sin(tyaw)                  # b1z = 0
        inv_na = lax.rsqrt(jnp.maximum(acc_x * acc_x + acc_y * acc_y + acc_z * acc_z, 1e-24))
        b3x = -acc_x * inv_na
        b3y = -acc_y * inv_na
        b3z = -acc_z * inv_na
        # b2 = normalize(b3 x b1)  (b1z = 0)
        c2x = -b3z * b1y
        c2y = b3z * b1x
        c2z = b3x * b1y - b3y * b1x
        inv_nb2 = lax.rsqrt(jnp.maximum(c2x * c2x + c2y * c2y + c2z * c2z, 1e-24))
        b2x = c2x * inv_nb2
        b2y = c2y * inv_nb2
        b2z = c2z * inv_nb2
        # first column of R_des: b2 x b3
        b23x = b2y * b3z - b2z * b3y
        b23y = b2z * b3x - b2x * b3z
        b23z = b2x * b3y - b2y * b3x

        # S = R_des^T R ; ang_error = [0.5(S21-S12), 0.5(S02-S20), 0.5(S10-S01)]
        s21 = b3x * r01 + b3y * r11 + b3z * r21
        s12 = b2x * r02 + b2y * r12 + b2z * r22
        s02 = b23x * r02 + b23y * r12 + b23z * r22
        s20 = b3x * r00 + b3y * r10 + b3z * r20
        s10 = b2x * r00 + b2y * r10 + b2z * r20
        s01 = b23x * r01 + b23y * r11 + b23z * r21
        ae_x = 0.5 * (s21 - s12)
        ae_y = 0.5 * (s02 - s20)
        ae_z = 0.5 * (s10 - s01)

        # ang_acc = -ang_error*attitude_gain - ang_vel*ang_rate_gain
        # (original `+ cross(ang_vel, ang_vel)` is identically zero -> dropped)
        aa_x = -ae_x * ag0 - wx * rg0
        aa_y = -ae_y * ag1 - wy * rg1
        aa_z = -ae_z * ag2 - wz * rg2

        # thrust/(-mass) = acc . R[:,2]   (mass and 2/max_thrusts folded into mixer')
        t_raw = acc_x * r02 + acc_y * r12 + acc_z * r22

        # cmd_i = mixer'_i . [aa_x, aa_y, aa_z, t_raw] - 1   (scalar-broadcast VPU FMAs)
        for i in range(4):
            o_ref[i, sl, :] = (
                mix[i][0] * aa_x + mix[i][1] * aa_y + mix[i][2] * aa_z + mix[i][3] * t_raw
                - 1.0
            )
        return carry

    lax.fori_loop(0, n_chunks, chunk, 0, unroll=unroll)


# --------------------------------------------------------------------------------------
# Wrapper
# --------------------------------------------------------------------------------------
def lee_position_controller_forward(
    params,
    root_state,
    target_pos=None,
    target_vel=None,
    target_acc=None,
    target_yaw=None,
    body_rate=False,
    *,
    max_block_rows=512,     # <= 512 sublane-rows (65536 drones, ~6 MiB in) per grid step
    target_grid_steps=4,    # keep >= 4 steps on large inputs so v7x megacore shards work
):
    batch_shape, root, tpos, tvel, tacc, tyaw = _prepare_inputs(
        root_state, target_pos, target_vel, target_acc, target_yaw
    )

    feats = jnp.concatenate([root, tpos, tvel, tacc, tyaw], axis=-1)   # [N, 23]
    n = feats.shape[0]

    nb, tb, steps = _choose_tiling(n, max_block_rows, target_grid_steps)
    n_pad = nb * 128
    if n_pad != n:
        feats = jnp.pad(feats, ((0, n_pad - n), (0, 0)))
    # Single fusible relayout copy to feature-major [23, NB, 128] (batch on sublane x lane).
    x = feats.T.reshape(_NF, nb, 128)

    pvec = _pack_params(params)              # [29] f32 -> SMEM

    in_bytes = _NF * tb * 128 * 4
    out_bytes = 4 * tb * 128 * 4
    vmem_limit = int(min(2 * (in_bytes + out_bytes) + (4 << 20), 100 << 20))

    out = pl.pallas_call(
        functools.partial(_lee_kernel, body_rate=body_rate),
        out_shape=jax.ShapeDtypeStruct((4, nb, 128), jnp.float32),
        grid_spec=pltpu.PrefetchScalarGridSpec(
            num_scalar_prefetch=0,
            grid=(steps,),
            in_specs=[
                pl.BlockSpec((_NF, tb, 128), lambda i: (0, i, 0)),
                pl.BlockSpec(memory_space=pltpu.MemorySpace.SMEM),
            ],
            out_specs=pl.BlockSpec((4, tb, 128), lambda i: (0, i, 0)),
        ),
        compiler_params=pltpu.CompilerParams(
            dimension_semantics=("parallel",),
            vmem_limit_bytes=vmem_limit,
        ),
    )(x, pvec)

    cmd = out.reshape(4, n_pad).T[:n]        # back to [N, 4] (small output transpose)
    return cmd.reshape(*batch_shape, 4)


# --------------------------------------------------------------------------------------
# Pure-JAX reference (mirrors the PyTorch module; for correctness sanity check)
# --------------------------------------------------------------------------------------
def _normalize(v):
    return v * lax.rsqrt(jnp.maximum(jnp.sum(v * v, -1, keepdims=True), 1e-24))


def lee_position_controller_reference(
    params, root_state, target_pos=None, target_vel=None, target_acc=None,
    target_yaw=None, body_rate=False,
):
    batch_shape, root, tpos, tvel, tacc, tyaw = _prepare_inputs(
        root_state, target_pos, target_vel, target_acc, target_yaw
    )
    pos, rot, vel, ang_vel = root[:, :3], root[:, 3:7], root[:, 7:10], root[:, 10:13]

    if not body_rate:
        qw, qv = rot[:, 0:1], rot[:, 1:4]
        a = ang_vel * (2.0 * qw * qw - 1.0)
        b = jnp.cross(qv, ang_vel) * qw * 2.0
        c = qv * jnp.sum(qv * ang_vel, -1, keepdims=True) * 2.0
        ang_vel = a - b + c

    acc = (
        (pos - tpos) * params["pos_gain"]
        + (vel - tvel) * params["vel_gain"]
        - jnp.array([0.0, 0.0, 1.0], jnp.float32) * params["g"]
        - tacc
    )

    w, x, y, z = rot[:, 0], rot[:, 1], rot[:, 2], rot[:, 3]
    R = jnp.stack(
        [
            jnp.stack([1 - 2 * (y * y + z * z), 2 * (x * y - w * z), 2 * (x * z + w * y)], -1),
            jnp.stack([2 * (x * y + w * z), 1 - 2 * (x * x + z * z), 2 * (y * z - w * x)], -1),
            jnp.stack([2 * (x * z - w * y), 2 * (y * z + w * x), 1 - 2 * (x * x + y * y)], -1),
        ],
        -2,
    )  # [N, 3, 3]

    b1_des = jnp.concatenate([jnp.cos(tyaw), jnp.sin(tyaw), jnp.zeros_like(tyaw)], -1)
    b3_des = -_normalize(acc)
    b2_des = _normalize(jnp.cross(b3_des, b1_des))
    R_des = jnp.stack([jnp.cross(b2_des, b3_des), b2_des, b3_des], -1)  # columns

    S = jnp.einsum("nki,nkj->nij", R_des, R)
    M = 0.5 * (S - jnp.swapaxes(S, -1, -2))
    ang_error = jnp.stack([M[:, 2, 1], M[:, 0, 2], M[:, 1, 0]], -1)

    ang_acc = -ang_error * params["attitude_gain"] - ang_vel * params["ang_rate_gain"]
    thrust = -params["mass"] * jnp.sum(acc * R[:, :, 2], -1, keepdims=True)
    aat = jnp.concatenate([ang_acc, thrust], -1)
    cmd = aat @ params["mixer"].T
    cmd = cmd / params["max_thrusts"] * 2.0 - 1.0
    return cmd.reshape(*batch_shape, 4)


# --------------------------------------------------------------------------------------
if __name__ == "__main__":
    # Deterministic synthetic quadrotor config (hummingbird-like); no files read.
    fc = 8.54858e-6
    uav_params = {
        "mass": 0.716,
        "inertia": {"xx": 0.007, "yy": 0.007, "zz": 0.012},
        "rotor_configuration": {
            "rotor_angles": [math.pi / 4, 3 * math.pi / 4, 5 * math.pi / 4, 7 * math.pi / 4],
            "arm_lengths": [0.17, 0.17, 0.17, 0.17],
            "force_constants": [fc, fc, fc, fc],
            "moment_constants": [fc * 0.016] * 4,
            "directions": [1.0, -1.0, 1.0, -1.0],
            "max_rotation_velocities": [838.0, 838.0, 838.0, 838.0],
        },
    }
    controller_params = {
        "position_gain": [6.0, 6.0, 6.0],
        "velocity_gain": [4.7, 4.7, 4.7],
        "attitude_gain": [3.0, 3.0, 0.15],
        "angular_rate_gain": [0.52, 0.52, 0.025],
    }
    params = make_params(9.81, uav_params, controller_params)

    key = jax.random.PRNGKey(0)
    k1, k2, k3, k4, k5, k6 = jax.random.split(key, 6)

    # --- small explicit-target test (batch 2 x 8 drones) -------------------------------
    batch_shape = (2, 8)
    root_state = jax.random.normal(k1, (*batch_shape, 13), dtype=jnp.float32)
    quat = root_state[..., 3:7]
    quat = quat / jnp.linalg.norm(quat, axis=-1, keepdims=True)
    root_state = root_state.at[..., 3:7].set(quat)

    target_pos = root_state[..., :3] + 0.5 * jax.random.normal(k2, (*batch_shape, 3), jnp.float32)
    target_vel = jax.random.normal(k3, (*batch_shape, 3), dtype=jnp.float32)
    target_acc = 0.5 * jax.random.normal(k4, (*batch_shape, 3), dtype=jnp.float32)
    target_yaw = jax.random.uniform(k5, (*batch_shape, 1), minval=-math.pi, maxval=math.pi)

    cmd = lee_position_controller_forward(
        params, root_state, target_pos, target_vel, target_acc, target_yaw
    )
    cmd = jax.block_until_ready(cmd)
    assert cmd.shape == (*batch_shape, 4), cmd.shape
    ref = lee_position_controller_reference(
        params, root_state, target_pos, target_vel, target_acc, target_yaw
    )
    assert jnp.allclose(cmd, ref, atol=1e-2, rtol=1e-3), float(jnp.max(jnp.abs(cmd - ref)))

    # --- default-argument path (hover target, yaw from quaternion) ---------------------
    cmd2 = jax.block_until_ready(lee_position_controller_forward(params, root_state))
    ref2 = lee_position_controller_reference(params, root_state)
    assert jnp.allclose(cmd2, ref2, atol=1e-2, rtol=1e-3), float(jnp.max(jnp.abs(cmd2 - ref2)))

    # --- body_rate=True path ------------------------------------------------------------
    cmd3 = jax.block_until_ready(
        lee_position_controller_forward(
            params, root_state, target_pos, target_vel, target_acc, target_yaw, body_rate=True
        )
    )
    ref3 = lee_position_controller_reference(
        params, root_state, target_pos, target_vel, target_acc, target_yaw, body_rate=True
    )
    assert jnp.allclose(cmd3, ref3, atol=1e-2, rtol=1e-3), float(jnp.max(jnp.abs(cmd3 - ref3)))

    # --- larger batch: exercises the multi-step grid + ragged padding path --------------
    n_big = 20000
    root_big = jax.random.normal(k6, (n_big, 13), dtype=jnp.float32)
    quat_big = root_big[..., 3:7]
    quat_big = quat_big / jnp.linalg.norm(quat_big, axis=-1, keepdims=True)
    root_big = root_big.at[..., 3:7].set(quat_big)
    cmd4 = jax.block_until_ready(lee_position_controller_forward(params, root_big))
    ref4 = lee_position_controller_reference(params, root_big)
    assert cmd4.shape == (n_big, 4), cmd4.shape
    assert jnp.allclose(cmd4, ref4, atol=1e-2, rtol=1e-3), float(jnp.max(jnp.abs(cmd4 - ref4)))

    print("KERNEL_OK")
</pallas_src>

<mosaic_0001>
module attributes {stable_mosaic.version = 11 : i64} {
  func.func @_lee_kernel(%arg0: i32, %arg1: memref<23x8x128xf32, #tpu.memory_space<vmem>>, %arg2: memref<29xf32, #tpu.memory_space<smem>>, %arg3: memref<4x8x128xf32, #tpu.memory_space<vmem>>) attributes {dimension_semantics = [#tpu.dimension_semantics<parallel>], iteration_bounds = array<i64: 1>, scalar_prefetch = 0 : i64, scratch_operands = 0 : i64, tpu.core_type = #tpu.core_type<tc>, window_params = [{transform_indices = @transform_0, window_bounds = array<i64: 23, 8, 128>}, {transform_indices = @transform_1, window_bounds = array<i64: 29>}, {transform_indices = @transform_2, window_bounds = array<i64: 4, 8, 128>}]} {
    %c0 = arith.constant 0 : index
    %0 = memref.load %arg2[%c0] : memref<29xf32, #tpu.memory_space<smem>>
    %c1 = arith.constant 1 : index
    %1 = memref.load %arg2[%c1] : memref<29xf32, #tpu.memory_space<smem>>
    %c2 = arith.constant 2 : index
    %2 = memref.load %arg2[%c2] : memref<29xf32, #tpu.memory_space<smem>>
    %c3 = arith.constant 3 : index
    %3 = memref.load %arg2[%c3] : memref<29xf32, #tpu.memory_space<smem>>
    %c4 = arith.constant 4 : index
    %4 = memref.load %arg2[%c4] : memref<29xf32, #tpu.memory_space<smem>>
    %c5 = arith.constant 5 : index
    %5 = memref.load %arg2[%c5] : memref<29xf32, #tpu.memory_space<smem>>
    %c6 = arith.constant 6 : index
    %6 = memref.load %arg2[%c6] : memref<29xf32, #tpu.memory_space<smem>>
    %c7 = arith.constant 7 : index
    %7 = memref.load %arg2[%c7] : memref<29xf32, #tpu.memory_space<smem>>
    %c8 = arith.constant 8 : index
    %8 = memref.load %arg2[%c8] : memref<29xf32, #tpu.memory_space<smem>>
    %c9 = arith.constant 9 : index
    %9 = memref.load %arg2[%c9] : memref<29xf32, #tpu.memory_space<smem>>
    %c10 = arith.constant 10 : index
    %10 = memref.load %arg2[%c10] : memref<29xf32, #tpu.memory_space<smem>>
    %c11 = arith.constant 11 : index
    %11 = memref.load %arg2[%c11] : memref<29xf32, #tpu.memory_space<smem>>
    %c12 = arith.constant 12 : index
    %12 = memref.load %arg2[%c12] : memref<29xf32, #tpu.memory_space<smem>>
    %c13 = arith.constant 13 : index
    %13 = memref.load %arg2[%c13] : memref<29xf32, #tpu.memory_space<smem>>
    %c14 = arith.constant 14 : index
    %14 = memref.load %arg2[%c14] : memref<29xf32, #tpu.memory_space<smem>>
    %c15 = arith.constant 15 : index
    %15 = memref.load %arg2[%c15] : memref<29xf32, #tpu.memory_space<smem>>
    %c16 = arith.constant 16 : index
    %16 = memref.load %arg2[%c16] : memref<29xf32, #tpu.memory_space<smem>>
    %c17 = arith.constant 17 : index
    %17 = memref.load %arg2[%c17] : memref<29xf32, #tpu.memory_space<smem>>
    %c18 = arith.constant 18 : index
    %18 = memref.load %arg2[%c18] : memref<29xf32, #tpu.memory_space<smem>>
    %c19 = arith.constant 19 : index
    %19 = memref.load %arg2[%c19] : memref<29xf32, #tpu.memory_space<smem>>
    %c20 = arith.constant 20 : index
    %20 = memref.load %arg2[%c20] : memref<29xf32, #tpu.memory_space<smem>>
    %c21 = arith.constant 21 : index
    %21 = memref.load %arg2[%c21] : memref<29xf32, #tpu.memory_space<smem>>
    %c22 = arith.constant 22 : index
    %22 = memref.load %arg2[%c22] : memref<29xf32, #tpu.memory_space<smem>>
    %c23 = arith.constant 23 : index
    %23 = memref.load %arg2[%c23] : memref<29xf32, #tpu.memory_space<smem>>
    %c24 = arith.constant 24 : index
    %24 = memref.load %arg2[%c24] : memref<29xf32, #tpu.memory_space<smem>>
    %c25 = arith.constant 25 : index
    %25 = memref.load %arg2[%c25] : memref<29xf32, #tpu.memory_space<smem>>
    %c26 = arith.constant 26 : index
    %26 = memref.load %arg2[%c26] : memref<29xf32, #tpu.memory_space<smem>>
    %c27 = arith.constant 27 : index
    %27 = memref.load %arg2[%c27] : memref<29xf32, #tpu.memory_space<smem>>
    %c28 = arith.constant 28 : index
    %28 = memref.load %arg2[%c28] : memref<29xf32, #tpu.memory_space<smem>>
    %c0_i32 = arith.constant 0 : i32
    %c8_i32 = arith.constant 8 : i32
    %29 = arith.muli %c0_i32, %c8_i32 : i32
    %30 = tpu.assume_multiple %29, 8 : i32
    %c0_0 = arith.constant 0 : index
    %31 = arith.index_cast %30 : i32 to index
    %c0_1 = arith.constant 0 : index
    %32 = vector.load %arg1[%c0_0, %31, %c0_1] : memref<23x8x128xf32, #tpu.memory_space<vmem>>, vector<1x8x128xf32>
    %33 = vector.shape_cast %32 : vector<1x8x128xf32> to vector<8x128xf32>
    %c1_2 = arith.constant 1 : index
    %34 = arith.index_cast %30 : i32 to index
    %c0_3 = arith.constant 0 : index
    %35 = vector.load %arg1[%c1_2, %34, %c0_3] : memref<23x8x128xf32, #tpu.memory_space<vmem>>, vector<1x8x128xf32>
    %36 = vector.shape_cast %35 : vector<1x8x128xf32> to vector<8x128xf32>
    %c2_4 = arith.constant 2 : index
    %37 = arith.index_cast %30 : i32 to index
    %c0_5 = arith.constant 0 : index
    %38 = vector.load %arg1[%c2_4, %37, %c0_5] : memref<23x8x128xf32, #tpu.memory_space<vmem>>, vector<1x8x128xf32>
    %39 = vector.shape_cast %38 : vector<1x8x128xf32> to vector<8x128xf32>
    %c3_6 = arith.constant 3 : index
    %40 = arith.index_cast %30 : i32 to index
    %c0_7 = arith.constant 0 : index
    %41 = vector.load %arg1[%c3_6, %40, %c0_7] : memref<23x8x128xf32, #tpu.memory_space<vmem>>, vector<1x8x128xf32>
    %42 = vector.shape_cast %41 : vector<1x8x128xf32> to vector<8x128xf32>
    %c4_8 = arith.constant 4 : index
    %43 = arith.index_cast %30 : i32 to index
    %c0_9 = arith.constant 0 : index
    %44 = vector.load %arg1[%c4_8, %43, %c0_9] : memref<23x8x128xf32, #tpu.memory_space<vmem>>, vector<1x8x128xf32>
    %45 = vector.shape_cast %44 : vector<1x8x128xf32> to vector<8x128xf32>
    %c5_10 = arith.constant 5 : index
    %46 = arith.index_cast %30 : i32 to index
    %c0_11 = arith.constant 0 : index
    %47 = vector.load %arg1[%c5_10, %46, %c0_11] : memref<23x8x128xf32, #tpu.memory_space<vmem>>, vector<1x8x128xf32>
    %48 = vector.shape_cast %47 : vector<1x8x128xf32> to vector<8x128xf32>
    %c6_12 = arith.constant 6 : index
    %49 = arith.index_cast %30 : i32 to index
    %c0_13 = arith.constant 0 : index
    %50 = vector.load %arg1[%c6_12, %49, %c0_13] : memref<23x8x128xf32, #tpu.memory_space<vmem>>, vector<1x8x128xf32>
    %51 = vector.shape_cast %50 : vector<1x8x128xf32> to vector<8x128xf32>
    %c10_14 = arith.constant 10 : index
    %52 = arith.index_cast %30 : i32 to index
    %c0_15 = arith.constant 0 : index
    %53 = vector.load %arg1[%c10_14, %52, %c0_15] : memref<23x8x128xf32, #tpu.memory_space<vmem>>, vector<1x8x128xf32>
    %54 = vector.shape_cast %53 : vector<1x8x128xf32> to vector<8x128xf32>
    %c11_16 = arith.constant 11 : index
    %55 = arith.index_cast %30 : i32 to index
    %c0_17 = arith.constant 0 : index
    %56 = vector.load %arg1[%c11_16, %55, %c0_17] : memref<23x8x128xf32, #tpu.memory_space<vmem>>, vector<1x8x128xf32>
    %57 = vector.shape_cast %56 : vector<1x8x128xf32> to vector<8x128xf32>
    %c12_18 = arith.constant 12 : index
    %58 = arith.index_cast %30 : i32 to index
    %c0_19 = arith.constant 0 : index
    %59 = vector.load %arg1[%c12_18, %58, %c0_19] : memref<23x8x128xf32, #tpu.memory_space<vmem>>, vector<1x8x128xf32>
    %60 = vector.shape_cast %59 : vector<1x8x128xf32> to vector<8x128xf32>
    %c7_20 = arith.constant 7 : index
    %61 = arith.index_cast %30 : i32 to index
    %c0_21 = arith.constant 0 : index
    %62 = vector.load %arg1[%c7_20, %61, %c0_21] : memref<23x8x128xf32, #tpu.memory_space<vmem>>, vector<1x8x128xf32>
    %63 = vector.shape_cast %62 : vector<1x8x128xf32> to vector<8x128xf32>
    %c8_22 = arith.constant 8 : index
    %64 = arith.index_cast %30 : i32 to index
    %c0_23 = arith.constant 0 : index
    %65 = vector.load %arg1[%c8_22, %64, %c0_23] : memref<23x8x128xf32, #tpu.memory_space<vmem>>, vector<1x8x128xf32>
    %66 = vector.shape_cast %65 : vector<1x8x128xf32> to vector<8x128xf32>
    %c9_24 = arith.constant 9 : index
    %67 = arith.index_cast %30 : i32 to index
    %c0_25 = arith.constant 0 : index
    %68 = vector.load %arg1[%c9_24, %67, %c0_25] : memref<23x8x128xf32, #tpu.memory_space<vmem>>, vector<1x8x128xf32>
    %69 = vector.shape_cast %68 : vector<1x8x128xf32> to vector<8x128xf32>
    %c13_26 = arith.constant 13 : index
    %70 = arith.index_cast %30 : i32 to index
    %c0_27 = arith.constant 0 : index
    %71 = vector.load %arg1[%c13_26, %70, %c0_27] : memref<23x8x128xf32, #tpu.memory_space<vmem>>, vector<1x8x128xf32>
    %72 = vector.shape_cast %71 : vector<1x8x128xf32> to vector<8x128xf32>
    %c14_28 = arith.constant 14 : index
    %73 = arith.index_cast %30 : i32 to index
    %c0_29 = arith.constant 0 : index
    %74 = vector.load %arg1[%c14_28, %73, %c0_29] : memref<23x8x128xf32, #tpu.memory_space<vmem>>, vector<1x8x128xf32>
    %75 = vector.shape_cast %74 : vector<1x8x128xf32> to vector<8x128xf32>
    %c15_30 = arith.constant 15 : index
    %76 = arith.index_cast %30 : i32 to index
    %c0_31 = arith.constant 0 : index
    %77 = vector.load %arg1[%c15_30, %76, %c0_31] : memref<23x8x128xf32, #tpu.memory_space<vmem>>, vector<1x8x128xf32>
    %78 = vector.shape_cast %77 : vector<1x8x128xf32> to vector<8x128xf32>
    %c16_32 = arith.constant 16 : index
    %79 = arith.index_cast %30 : i32 to index
    %c0_33 = arith.constant 0 : index
    %80 = vector.load %arg1[%c16_32, %79, %c0_33] : memref<23x8x128xf32, #tpu.memory_space<vmem>>, vector<1x8x128xf32>
    %81 = vector.shape_cast %80 : vector<1x8x128xf32> to vector<8x128xf32>
    %c17_34 = arith.constant 17 : index
    %82 = arith.index_cast %30 : i32 to index
    %c0_35 = arith.constant 0 : index
    %83 = vector.load %arg1[%c17_34, %82, %c0_35] : memref<23x8x128xf32, #tpu.memory_space<vmem>>, vector<1x8x128xf32>
    %84 = vector.shape_cast %83 : vector<1x8x128xf32> to vector<8x128xf32>
    %c18_36 = arith.constant 18 : index
    %85 = arith.index_cast %30 : i32 to index
    %c0_37 = arith.constant 0 : index
    %86 = vector.load %arg1[%c18_36, %85, %c0_37] : memref<23x8x128xf32, #tpu.memory_space<vmem>>, vector<1x8x128xf32>
    %87 = vector.shape_cast %86 : vector<1x8x128xf32> to vector<8x128xf32>
    %c19_38 = arith.constant 19 : index
    %88 = arith.index_cast %30 : i32 to index
    %c0_39 = arith.constant 0 : index
    %89 = vector.load %arg1[%c19_38, %88, %c0_39] : memref<23x8x128xf32, #tpu.memory_space<vmem>>, vector<1x8x128xf32>
    %90 = vector.shape_cast %89 : vector<1x8x128xf32> to vector<8x128xf32>
    %c20_40 = arith.constant 20 : index
    %91 = arith.index_cast %30 : i32 to index
    %c0_41 = arith.constant 0 : index
    %92 = vector.load %arg1[%c20_40, %91, %c0_41] : memref<23x8x128xf32, #tpu.memory_space<vmem>>, vector<1x8x128xf32>
    %93 = vector.shape_cast %92 : vector<1x8x128xf32> to vector<8x128xf32>
    %c21_42 = arith.constant 21 : index
    %94 = arith.index_cast %30 : i32 to index
    %c0_43 = arith.constant 0 : index
    %95 = vector.load %arg1[%c21_42, %94, %c0_43] : memref<23x8x128xf32, #tpu.memory_space<vmem>>, vector<1x8x128xf32>
    %96 = vector.shape_cast %95 : vector<1x8x128xf32> to vector<8x128xf32>
    %c22_44 = arith.constant 22 : index
    %97 = arith.index_cast %30 : i32 to index
    %c0_45 = arith.constant 0 : index
    %98 = vector.load %arg1[%c22_44, %97, %c0_45] : memref<23x8x128xf32, #tpu.memory_space<vmem>>, vector<1x8x128xf32>
    %99 = vector.shape_cast %98 : vector<1x8x128xf32> to vector<8x128xf32>
    %cst = arith.constant 2.000000e+00 : f32
    %100 = vector.broadcast %cst : f32 to vector<8x128xf32>
    %101 = arith.mulf %100, %42 : vector<8x128xf32>
    %102 = arith.mulf %101, %42 : vector<8x128xf32>
    %cst_46 = arith.constant 1.000000e+00 : f32
    %103 = vector.broadcast %cst_46 : f32 to vector<8x128xf32>
    %104 = arith.subf %102, %103 : vector<8x128xf32>
    %105 = arith.mulf %48, %60 : vector<8x128xf32>
    %106 = arith.mulf %51, %57 : vector<8x128xf32>
    %107 = arith.subf %105, %106 : vector<8x128xf32>
    %108 = arith.mulf %51, %54 : vector<8x128xf32>
    %109 = arith.mulf %45, %60 : vector<8x128xf32>
    %110 = arith.subf %108, %109 : vector<8x128xf32>
    %111 = arith.mulf %45, %57 : vector<8x128xf32>
    %112 = arith.mulf %48, %54 : vector<8x128xf32>
    %113 = arith.subf %111, %112 : vector<8x128xf32>
    %114 = arith.mulf %45, %54 : vector<8x128xf32>
    %115 = arith.mulf %48, %57 : vector<8x128xf32>
    %116 = arith.addf %114, %115 : vector<8x128xf32>
    %117 = arith.mulf %51, %60 : vector<8x128xf32>
    %118 = arith.addf %116, %117 : vector<8x128xf32>
    %119 = arith.mulf %54, %104 : vector<8x128xf32>
    %cst_47 = arith.constant 2.000000e+00 : f32
    %120 = vector.broadcast %cst_47 : f32 to vector<8x128xf32>
    %121 = arith.mulf %120, %42 : vector<8x128xf32>
    %122 = arith.mulf %121, %107 : vector<8x128xf32>
    %123 = arith.subf %119, %122 : vector<8x128xf32>
    %cst_48 = arith.constant 2.000000e+00 : f32
    %124 = vector.broadcast %cst_48 : f32 to vector<8x128xf32>
    %125 = arith.mulf %124, %45 : vector<8x128xf32>
    %126 = arith.mulf %125, %118 : vector<8x128xf32>
    %127 = arith.addf %123, %126 : vector<8x128xf32>
    %128 = arith.mulf %57, %104 : vector<8x128xf32>
    %cst_49 = arith.constant 2.000000e+00 : f32
    %129 = vector.broadcast %cst_49 : f32 to vector<8x128xf32>
    %130 = arith.mulf %129, %42 : vector<8x128xf32>
    %131 = arith.mulf %130, %110 : vector<8x128xf32>
    %132 = arith.subf %128, %131 : vector<8x128xf32>
    %cst_50 = arith.constant 2.000000e+00 : f32
    %133 = vector.broadcast %cst_50 : f32 to vector<8x128xf32>
    %134 = arith.mulf %133, %48 : vector<8x128xf32>
    %135 = arith.mulf %134, %118 : vector<8x128xf32>
    %136 = arith.addf %132, %135 : vector<8x128xf32>
    %137 = arith.mulf %60, %104 : vector<8x128xf32>
    %cst_51 = arith.constant 2.000000e+00 : f32
    %138 = vector.broadcast %cst_51 : f32 to vector<8x128xf32>
    %139 = arith.mulf %138, %42 : vector<8x128xf32>
    %140 = arith.mulf %139, %113 : vector<8x128xf32>
    %141 = arith.subf %137, %140 : vector<8x128xf32>
    %cst_52 = arith.constant 2.000000e+00 : f32
    %142 = vector.broadcast %cst_52 : f32 to vector<8x128xf32>
    %143 = arith.mulf %142, %51 : vector<8x128xf32>
    %144 = arith.mulf %143, %118 : vector<8x128xf32>
    %145 = arith.addf %141, %144 : vector<8x128xf32>
    %146 = arith.subf %33, %72 : vector<8x128xf32>
    %147 = vector.broadcast %0 : f32 to vector<8x128xf32>
    %148 = arith.mulf %146, %147 : vector<8x128xf32>
    %149 = arith.subf %63, %81 : vector<8x128xf32>
    %150 = vector.broadcast %3 : f32 to vector<8x128xf32>
    %151 = arith.mulf %149, %150 : vector<8x128xf32>
    %152 = arith.addf %148, %151 : vector<8x128xf32>
    %153 = arith.subf %152, %90 : vector<8x128xf32>
    %154 = arith.subf %36, %75 : vector<8x128xf32>
    %155 = vector.broadcast %1 : f32 to vector<8x128xf32>
    %156 = arith.mulf %154, %155 : vector<8x128xf32>
    %157 = arith.subf %66, %84 : vector<8x128xf32>
    %158 = vector.broadcast %4 : f32 to vector<8x128xf32>
    %159 = arith.mulf %157, %158 : vector<8x128xf32>
    %160 = arith.addf %156, %159 : vector<8x128xf32>
    %161 = arith.subf %160, %93 : vector<8x128xf32>
    %162 = arith.subf %39, %78 : vector<8x128xf32>
    %163 = vector.broadcast %2 : f32 to vector<8x128xf32>
    %164 = arith.mulf %162, %163 : vector<8x128xf32>
    %165 = arith.subf %69, %87 : vector<8x128xf32>
    %166 = vector.broadcast %5 : f32 to vector<8x128xf32>
    %167 = arith.mulf %165, %166 : vector<8x128xf32>
    %168 = arith.addf %164, %167 : vector<8x128xf32>
    %169 = vector.broadcast %6 : f32 to vector<8x128xf32>
    %170 = arith.subf %168, %169 : vector<8x128xf32>
    %171 = arith.subf %170, %96 : vector<8x128xf32>
    %172 = arith.mulf %48, %48 : vector<8x128xf32>
    %173 = arith.mulf %51, %51 : vector<8x128xf32>
    %174 = arith.addf %172, %173 : vector<8x128xf32>
    %cst_53 = arith.constant 2.000000e+00 : f32
    %175 = vector.broadcast %cst_53 : f32 to vector<8x128xf32>
    %176 = arith.mulf %175, %174 : vector<8x128xf32>
    %cst_54 = arith.constant 1.000000e+00 : f32
    %177 = vector.broadcast %cst_54 : f32 to vector<8x128xf32>
    %178 = arith.subf %177, %176 : vector<8x128xf32>
    %179 = arith.mulf %45, %48 : vector<8x128xf32>
    %180 = arith.mulf %42, %51 : vector<8x128xf32>
    %181 = arith.subf %179, %180 : vector<8x128xf32>
    %cst_55 = arith.constant 2.000000e+00 : f32
    %182 = vector.broadcast %cst_55 : f32 to vector<8x128xf32>
    %183 = arith.mulf %182, %181 : vector<8x128xf32>
    %184 = arith.mulf %45, %51 : vector<8x128xf32>
    %185 = arith.mulf %42, %48 : vector<8x128xf32>
    %186 = arith.addf %184, %185 : vector<8x128xf32>
    %cst_56 = arith.constant 2.000000e+00 : f32
    %187 = vector.broadcast %cst_56 : f32 to vector<8x128xf32>
    %188 = arith.mulf %187, %186 : vector<8x128xf32>
    %189 = arith.mulf %45, %48 : vector<8x128xf32>
    %190 = arith.mulf %42, %51 : vector<8x128xf32>
    %191 = arith.addf %189, %190 : vector<8x128xf32>
    %cst_57 = arith.constant 2.000000e+00 : f32
    %192 = vector.broadcast %cst_57 : f32 to vector<8x128xf32>
    %193 = arith.mulf %192, %191 : vector<8x128xf32>
    %194 = arith.mulf %45, %45 : vector<8x128xf32>
    %195 = arith.mulf %51, %51 : vector<8x128xf32>
    %196 = arith.addf %194, %195 : vector<8x128xf32>
    %cst_58 = arith.constant 2.000000e+00 : f32
    %197 = vector.broadcast %cst_58 : f32 to vector<8x128xf32>
    %198 = arith.mulf %197, %196 : vector<8x128xf32>
    %cst_59 = arith.constant 1.000000e+00 : f32
    %199 = vector.broadcast %cst_59 : f32 to vector<8x128xf32>
    %200 = arith.subf %199, %198 : vector<8x128xf32>
    %201 = arith.mulf %48, %51 : vector<8x128xf32>
    %202 = arith.mulf %42, %45 : vector<8x128xf32>
    %203 = arith.subf %201, %202 : vector<8x128xf32>
    %cst_60 = arith.constant 2.000000e+00 : f32
    %204 = vector.broadcast %cst_60 : f32 to vector<8x128xf32>
    %205 = arith.mulf %204, %203 : vector<8x128xf32>
    %206 = arith.mulf %45, %51 : vector<8x128xf32>
    %207 = arith.mulf %42, %48 : vector<8x128xf32>
    %208 = arith.subf %206, %207 : vector<8x128xf32>
    %cst_61 = arith.constant 2.000000e+00 : f32
    %209 = vector.broadcast %cst_61 : f32 to vector<8x128xf32>
    %210 = arith.mulf %209, %208 : vector<8x128xf32>
    %211 = arith.mulf %48, %51 : vector<8x128xf32>
    %212 = arith.mulf %42, %45 : vector<8x128xf32>
    %213 = arith.addf %211, %212 : vector<8x128xf32>
    %cst_62 = arith.constant 2.000000e+00 : f32
    %214 = vector.broadcast %cst_62 : f32 to vector<8x128xf32>
    %215 = arith.mulf %214, %213 : vector<8x128xf32>
    %216 = arith.mulf %45, %45 : vector<8x128xf32>
    %217 = arith.mulf %48, %48 : vector<8x128xf32>
    %218 = arith.addf %216, %217 : vector<8x128xf32>
    %cst_63 = arith.constant 2.000000e+00 : f32
    %219 = vector.broadcast %cst_63 : f32 to vector<8x128xf32>
    %220 = arith.mulf %219, %218 : vector<8x128xf32>
    %cst_64 = arith.constant 1.000000e+00 : f32
    %221 = vector.broadcast %cst_64 : f32 to vector<8x128xf32>
    %222 = arith.subf %221, %220 : vector<8x128xf32>
    %223 = math.cos %99 : vector<8x128xf32>
    %224 = math.sin %99 : vector<8x128xf32>
    %225 = arith.mulf %153, %153 : vector<8x128xf32>
    %226 = arith.mulf %161, %161 : vector<8x128xf32>
    %227 = arith.addf %225, %226 : vector<8x128xf32>
    %228 = arith.mulf %171, %171 : vector<8x128xf32>
    %229 = arith.addf %227, %228 : vector<8x128xf32>
    %cst_65 = arith.constant 1.000000e-24 : f32
    %230 = vector.broadcast %cst_65 : f32 to vector<8x128xf32>
    %231 = arith.maximumf %229, %230 : vector<8x128xf32>
    %232 = math.rsqrt %231 : vector<8x128xf32>
    %cst_66 = arith.constant 0.000000e+00 : f32
    %233 = vector.broadcast %cst_66 : f32 to vector<8x128xf32>
    %234 = arith.subf %233, %153 : vector<8x128xf32>
    %235 = arith.mulf %234, %232 : vector<8x128xf32>
    %cst_67 = arith.constant 0.000000e+00 : f32
    %236 = vector.broadcast %cst_67 : f32 to vector<8x128xf32>
    %237 = arith.subf %236, %161 : vector<8x128xf32>
    %238 = arith.mulf %237, %232 : vector<8x128xf32>
    %cst_68 = arith.constant 0.000000e+00 : f32
    %239 = vector.broadcast %cst_68 : f32 to vector<8x128xf32>
    %240 = arith.subf %239, %171 : vector<8x128xf32>
    %241 = arith.mulf %240, %232 : vector<8x128xf32>
    %cst_69 = arith.constant 0.000000e+00 : f32
    %242 = vector.broadcast %cst_69 : f32 to vector<8x128xf32>
    %243 = arith.subf %242, %241 : vector<8x128xf32>
    %244 = arith.mulf %243, %224 : vector<8x128xf32>
    %245 = arith.mulf %241, %223 : vector<8x128xf32>
    %246 = arith.mulf %235, %224 : vector<8x128xf32>
    %247 = arith.mulf %238, %223 : vector<8x128xf32>
    %248 = arith.subf %246, %247 : vector<8x128xf32>
    %249 = arith.mulf %244, %244 : vector<8x128xf32>
    %250 = arith.mulf %245, %245 : vector<8x128xf32>
    %251 = arith.addf %249, %250 : vector<8x128xf32>
    %252 = arith.mulf %248, %248 : vector<8x128xf32>
    %253 = arith.addf %251, %252 : vector<8x128xf32>
    %cst_70 = arith.constant 1.000000e-24 : f32
    %254 = vector.broadcast %cst_70 : f32 to vector<8x128xf32>
    %255 = arith.maximumf %253, %254 : vector<8x128xf32>
    %256 = math.rsqrt %255 : vector<8x128xf32>
    %257 = arith.mulf %244, %256 : vector<8x128xf32>
    %258 = arith.mulf %245, %256 : vector<8x128xf32>
    %259 = arith.mulf %248, %256 : vector<8x128xf32>
    %260 = arith.mulf %258, %241 : vector<8x128xf32>
    %261 = arith.mulf %259, %238 : vector<8x128xf32>
    %262 = arith.subf %260, %261 : vector<8x128xf32>
    %263 = arith.mulf %259, %235 : vector<8x128xf32>
    %264 = arith.mulf %257, %241 : vector<8x128xf32>
    %265 = arith.subf %263, %264 : vector<8x128xf32>
    %266 = arith.mulf %257, %238 : vector<8x128xf32>
    %267 = arith.mulf %258, %235 : vector<8x128xf32>
    %268 = arith.subf %266, %267 : vector<8x128xf32>
    %269 = arith.mulf %235, %183 : vector<8x128xf32>
    %270 = arith.mulf %238, %200 : vector<8x128xf32>
    %271 = arith.addf %269, %270 : vector<8x128xf32>
    %272 = arith.mulf %241, %215 : vector<8x128xf32>
    %273 = arith.addf %271, %272 : vector<8x128xf32>
    %274 = arith.mulf %257, %188 : vector<8x128xf32>
    %275 = arith.mulf %258, %205 : vector<8x128xf32>
    %276 = arith.addf %274, %275 : vector<8x128xf32>
    %277 = arith.mulf %259, %222 : vector<8x128xf32>
    %278 = arith.addf %276, %277 : vector<8x128xf32>
    %279 = arith.mulf %262, %188 : vector<8x128xf32>
    %280 = arith.mulf %265, %205 : vector<8x128xf32>
    %281 = arith.addf %279, %280 : vector<8x128xf32>
    %282 = arith.mulf %268, %222 : vector<8x128xf32>
    %283 = arith.addf %281, %282 : vector<8x128xf32>
    %284 = arith.mulf %235, %178 : vector<8x128xf32>
    %285 = arith.mulf %238, %193 : vector<8x128xf32>
    %286 = arith.addf %284, %285 : vector<8x128xf32>
    %287 = arith.mulf %241, %210 : vector<8x128xf32>
    %288 = arith.addf %286, %287 : vector<8x128xf32>
    %289 = arith.mulf %257, %178 : vector<8x128xf32>
    %290 = arith.mulf %258, %193 : vector<8x128xf32>
    %291 = arith.addf %289, %290 : vector<8x128xf32>
    %292 = arith.mulf %259, %210 : vector<8x128xf32>
    %293 = arith.addf %291, %292 : vector<8x128xf32>
    %294 = arith.mulf %262, %183 : vector<8x128xf32>
    %295 = arith.mulf %265, %200 : vector<8x128xf32>
    %296 = arith.addf %294, %295 : vector<8x128xf32>
    %297 = arith.mulf %268, %215 : vector<8x128xf32>
    %298 = arith.addf %296, %297 : vector<8x128xf32>
    %299 = arith.subf %273, %278 : vector<8x128xf32>
    %cst_71 = arith.constant 5.000000e-01 : f32
    %300 = vector.broadcast %cst_71 : f32 to vector<8x128xf32>
    %301 = arith.mulf %300, %299 : vector<8x128xf32>
    %302 = arith.subf %283, %288 : vector<8x128xf32>
    %cst_72 = arith.constant 5.000000e-01 : f32
    %303 = vector.broadcast %cst_72 : f32 to vector<8x128xf32>
    %304 = arith.mulf %303, %302 : vector<8x128xf32>
    %305 = arith.subf %293, %298 : vector<8x128xf32>
    %cst_73 = arith.constant 5.000000e-01 : f32
    %306 = vector.broadcast %cst_73 : f32 to vector<8x128xf32>
    %307 = arith.mulf %306, %305 : vector<8x128xf32>
    %cst_74 = arith.constant 0.000000e+00 : f32
    %308 = vector.broadcast %cst_74 : f32 to vector<8x128xf32>
    %309 = arith.subf %308, %301 : vector<8x128xf32>
    %310 = vector.broadcast %7 : f32 to vector<8x128xf32>
    %311 = arith.mulf %309, %310 : vector<8x128xf32>
    %312 = vector.broadcast %10 : f32 to vector<8x128xf32>
    %313 = arith.mulf %127, %312 : vector<8x128xf32>
    %314 = arith.subf %311, %313 : vector<8x128xf32>
    %cst_75 = arith.constant 0.000000e+00 : f32
    %315 = vector.broadcast %cst_75 : f32 to vector<8x128xf32>
    %316 = arith.subf %315, %304 : vector<8x128xf32>
    %317 = vector.broadcast %8 : f32 to vector<8x128xf32>
    %318 = arith.mulf %316, %317 : vector<8x128xf32>
    %319 = vector.broadcast %11 : f32 to vector<8x128xf32>
    %320 = arith.mulf %136, %319 : vector<8x128xf32>
    %321 = arith.subf %318, %320 : vector<8x128xf32>
    %cst_76 = arith.constant 0.000000e+00 : f32
    %322 = vector.broadcast %cst_76 : f32 to vector<8x128xf32>
    %323 = arith.subf %322, %307 : vector<8x128xf32>
    %324 = vector.broadcast %9 : f32 to vector<8x128xf32>
    %325 = arith.mulf %323, %324 : vector<8x128xf32>
    %326 = vector.broadcast %12 : f32 to vector<8x128xf32>
    %327 = arith.mulf %145, %326 : vector<8x128xf32>
    %328 = arith.subf %325, %327 : vector<8x128xf32>
    %329 = arith.mulf %153, %188 : vector<8x128xf32>
    %330 = arith.mulf %161, %205 : vector<8x128xf32>
    %331 = arith.addf %329, %330 : vector<8x128xf32>
    %332 = arith.mulf %171, %222 : vector<8x128xf32>
    %333 = arith.addf %331, %332 : vector<8x128xf32>
    %334 = vector.broadcast %13 : f32 to vector<8x128xf32>
    %335 = arith.mulf %334, %314 : vector<8x128xf32>
    %336 = vector.broadcast %14 : f32 to vector<8x128xf32>
    %337 = arith.mulf %336, %321 : vector<8x128xf32>
    %338 = arith.addf %335, %337 : vector<8x128xf32>
    %339 = vector.broadcast %15 : f32 to vector<8x128xf32>
    %340 = arith.mulf %339, %328 : vector<8x128xf32>
    %341 = arith.addf %338, %340 : vector<8x128xf32>
    %342 = vector.broadcast %16 : f32 to vector<8x128xf32>
    %343 = arith.mulf %342, %333 : vector<8x128xf32>
    %344 = arith.addf %341, %343 : vector<8x128xf32>
    %cst_77 = arith.constant 1.000000e+00 : f32
    %345 = vector.broadcast %cst_77 : f32 to vector<8x128xf32>
    %346 = arith.subf %344, %345 : vector<8x128xf32>
    %c0_78 = arith.constant 0 : index
    %347 = arith.index_cast %30 : i32 to index
    %c0_79 = arith.constant 0 : index
    %348 = vector.load %arg3[%c0_78, %347, %c0_79] : memref<4x8x128xf32, #tpu.memory_space<vmem>>, vector<1x8x128xf32>
    %349 = vector.shape_cast %348 : vector<1x8x128xf32> to vector<8x128xf32>
    %350 = vector.shape_cast %346 : vector<8x128xf32> to vector<1x8x128xf32>
    tpu.vector_store %arg3[%c0_78, %347, %c0_79], %350 {strides = array<i32>} : memref<4x8x128xf32, #tpu.memory_space<vmem>>, vector<1x8x128xf32>,
    %351 = vector.broadcast %17 : f32 to vector<8x128xf32>
    %352 = arith.mulf %351, %314 : vector<8x128xf32>
    %353 = vector.broadcast %18 : f32 to vector<8x128xf32>
    %354 = arith.mulf %353, %321 : vector<8x128xf32>
    %355 = arith.addf %352, %354 : vector<8x128xf32>
    %356 = vector.broadcast %19 : f32 to vector<8x128xf32>
    %357 = arith.mulf %356, %328 : vector<8x128xf32>
    %358 = arith.addf %355, %357 : vector<8x128xf32>
    %359 = vector.broadcast %20 : f32 to vector<8x128xf32>
    %360 = arith.mulf %359, %333 : vector<8x128xf32>
    %361 = arith.addf %358, %360 : vector<8x128xf32>
    %cst_80 = arith.constant 1.000000e+00 : f32
    %362 = vector.broadcast %cst_80 : f32 to vector<8x128xf32>
    %363 = arith.subf %361, %362 : vector<8x128xf32>
    %c1_81 = arith.constant 1 : index
    %364 = arith.index_cast %30 : i32 to index
    %c0_82 = arith.constant 0 : index
    %365 = vector.load %arg3[%c1_81, %364, %c0_82] : memref<4x8x128xf32, #tpu.memory_space<vmem>>, vector<1x8x128xf32>
    %366 = vector.shape_cast %365 : vector<1x8x128xf32> to vector<8x128xf32>
    %367 = vector.shape_cast %363 : vector<8x128xf32> to vector<1x8x128xf32>
    tpu.vector_store %arg3[%c1_81, %364, %c0_82], %367 {strides = array<i32>} : memref<4x8x128xf32, #tpu.memory_space<vmem>>, vector<1x8x128xf32>,
    %368 = vector.broadcast %21 : f32 to vector<8x128xf32>
    %369 = arith.mulf %368, %314 : vector<8x128xf32>
    %370 = vector.broadcast %22 : f32 to vector<8x128xf32>
    %371 = arith.mulf %370, %321 : vector<8x128xf32>
    %372 = arith.addf %369, %371 : vector<8x128xf32>
    %373 = vector.broadcast %23 : f32 to vector<8x128xf32>
    %374 = arith.mulf %373, %328 : vector<8x128xf32>
    %375 = arith.addf %372, %374 : vector<8x128xf32>
    %376 = vector.broadcast %24 : f32 to vector<8x128xf32>
    %377 = arith.mulf %376, %333 : vector<8x128xf32>
    %378 = arith.addf %375, %377 : vector<8x128xf32>
    %cst_83 = arith.constant 1.000000e+00 : f32
    %379 = vector.broadcast %cst_83 : f32 to vector<8x128xf32>
    %380 = arith.subf %378, %379 : vector<8x128xf32>
    %c2_84 = arith.constant 2 : index
    %381 = arith.index_cast %30 : i32 to index
    %c0_85 = arith.constant 0 : index
    %382 = vector.load %arg3[%c2_84, %381, %c0_85] : memref<4x8x128xf32, #tpu.memory_space<vmem>>, vector<1x8x128xf32>
    %383 = vector.shape_cast %382 : vector<1x8x128xf32> to vector<8x128xf32>
    %384 = vector.shape_cast %380 : vector<8x128xf32> to vector<1x8x128xf32>
    tpu.vector_store %arg3[%c2_84, %381, %c0_85], %384 {strides = array<i32>} : memref<4x8x128xf32, #tpu.memory_space<vmem>>, vector<1x8x128xf32>,
    %385 = vector.broadcast %25 : f32 to vector<8x128xf32>
    %386 = arith.mulf %385, %314 : vector<8x128xf32>
    %387 = vector.broadcast %26 : f32 to vector<8x128xf32>
    %388 = arith.mulf %387, %321 : vector<8x128xf32>
    %389 = arith.addf %386, %388 : vector<8x128xf32>
    %390 = vector.broadcast %27 : f32 to vector<8x128xf32>
    %391 = arith.mulf %390, %328 : vector<8x128xf32>
    %392 = arith.addf %389, %391 : vector<8x128xf32>
    %393 = vector.broadcast %28 : f32 to vector<8x128xf32>
    %394 = arith.mulf %393, %333 : vector<8x128xf32>
    %395 = arith.addf %392, %394 : vector<8x128xf32>
    %cst_86 = arith.constant 1.000000e+00 : f32
    %396 = vector.broadcast %cst_86 : f32 to vector<8x128xf32>
    %397 = arith.subf %395, %396 : vector<8x128xf32>
    %c3_87 = arith.constant 3 : index
    %398 = arith.index_cast %30 : i32 to index
    %c0_88 = arith.constant 0 : index
    %399 = vector.load %arg3[%c3_87, %398, %c0_88] : memref<4x8x128xf32, #tpu.memory_space<vmem>>, vector<1x8x128xf32>
    %400 = vector.shape_cast %399 : vector<1x8x128xf32> to vector<8x128xf32>
    %401 = vector.shape_cast %397 : vector<8x128xf32> to vector<1x8x128xf32>
    tpu.vector_store %arg3[%c3_87, %398, %c0_88], %401 {strides = array<i32>} : memref<4x8x128xf32, #tpu.memory_space<vmem>>, vector<1x8x128xf32>,
    %c1_i32 = arith.constant 1 : i32
    return
  }
  func.func @transform_0(%arg0: i32) -> (i32, i32, i32) {
    %c0_i32 = arith.constant 0 : i32
    %c0_i32_0 = arith.constant 0 : i32
    %c0_i32_1 = arith.constant 0 : i32
    return %c0_i32, %arg0, %c0_i32_0 : i32, i32, i32
  }
  func.func @transform_1(%arg0: i32) -> i32 {
    %c0_i32 = arith.constant 0 : i32
    %c0_i32_0 = arith.constant 0 : i32
    return %c0_i32 : i32
  }
  func.func @transform_2(%arg0: i32) -> (i32, i32, i32) {
    %c0_i32 = arith.constant 0 : i32
    %c0_i32_0 = arith.constant 0 : i32
    %c0_i32_1 = arith.constant 0 : i32
    return %c0_i32, %arg0, %c0_i32_0 : i32, i32, i32
  }
}

</mosaic_0001>

<bundles_post_ra>
// kernel: tpu_custom_call.1
= control target key start
LH: loop header
LB: loop body
LE: loop exit
PB: predicated region body
PF: predicated region fallthrough
CT: control target
= control target key end

     0   :  { %7 = vsyncpa [#allocation3], 0  ;;  %s1079_s0 = inlined_call_operand.hbm [shape: f32[23,8,128], index: 0, kind: input, shape index: {}]   ;;  %s1080_s1 = inlined_call_operand.vmem [shape: f32[29], index: 1, kind: input, shape index: {}]   ;;  %s1081_s2 = inlined_call_operand.hbm [shape: f32[4,8,128], index: 2, kind: output, shape index: {}]  }
   0x1   :  { %8 = vsyncpa [#allocation5], 0 }
   0x2   :  { %9 = vsyncpa [#allocation4], 0  ;;  %s750_s9 = smov [#allocation2]   ;;  %s28_s13 = sshll.u32 %s1080_s1, 4  ;;  %s29_s13 = int_to_ptr.vmem [resolvable:$true] %s28_s13 }
   0x3   :  { %s15_s10 = sshll.u32 %s750_s9, 4  ;;  %s16_s10 = int_to_ptr.vmem [resolvable:$true] %s15_s10 }
   0x4   :  { %s700_s14 = scalar_lea.vmem %s16_s10, 2944  ;;  %p705_p1 = scmp.lt.s32.totalorder %s16_s10, %s16_s10 }
   0x5   :  { %p701_p0 = scmp.ne.s32.totalorder %s16_s10, %s700_s14  ;;  %p706_p2 = scmp.lt.s32.totalorder %s700_s14, %s700_s14 }
   0x7   :  { %p707_p3 = por %p706_p2, %p705_p1 }
   0x9   :  { %p708_p4 = pnand %p707_p3, %p701_p0 }
   0xb   :  { %711 = shalt.err (!%p708_p4)
}
   0xc   :  { %s751_s15 = smov 128   ;;  %s752_s16 = smov 8  }
   0xd   :  { %21 = dma.hbm_to_vmem [thread:$0]  %s1079_s0, 2944, %s16_s10, [#allocation3], %s751_s15, %s751_s15, %s752_s16  }
   0xe   :  { %s712_s19 = scalar_lea.vmem %s29_s13, 16  ;;  %p717_p6 = scmp.lt.s32.totalorder %s29_s13, %s29_s13 }
   0xf   :  { %p713_p5 = scmp.ne.s32.totalorder %s29_s13, %s712_s19  ;;  %p718_p7 = scmp.lt.s32.totalorder %s712_s19, %s712_s19 }
  0x11   :  { %p719_p8 = por %p718_p7, %p717_p6 }
  0x13   :  { %p720_p9 = pnand %p719_p8, %p713_p5 }
  0x15   :  { %723 = shalt.err (!%p720_p9)
}
  0x16   :  { %s753_s1 = smov [#allocation6]  }
  0x17   :  { %31 = dma.vmem_to_smem %s29_s13, 16, %s753_s1, [#allocation5]  }
  0x18   :  { %744 = dma.done.wait [#allocation3], 2944  }
  0x19   :  { %745 = vsyncadd [#allocation3], 4294964352 }
  0x1a   :  { %746 = dma.done.wait [#allocation5], 16  }
  0x1b   :  { %747 = vsyncadd [#allocation5], 4294967280 }
  0x1c   :  { %38 = sfence }
  0x1d   :  { %s785_s20 = sld [smem:[#allocation6]]  ;;  %v74_v0 = vld [vmem:[#allocation2 + $0x10] sm:$0xff]  ;;  %v104_v1 = vld [vmem:[#allocation2 + $0x48] sm:$0xff]  ;;  %v113_v2 = vld [vmem:[#allocation2 + $0x78] sm:$0xff] }
  0x1e   :  { %s787_s21 = sld [smem:[#allocation6 + $0x2]]  ;;  %v122_v3 = vld [vmem:[#allocation2 + $0x90] sm:$0xff]  ;;  %v68_v4 = vld [vmem:[#allocation2] sm:$0xff]  ;;  %v71_v5 = vld [vmem:[#allocation2 + $0x8] sm:$0xff]  ;;  %v186_v12 = vsub.f32 %v74_v0, %v113_v2 }
  0x1f   :  { %s789_s0 = sld [smem:[#allocation6 + $0x5]]  ;;  %v98_v6 = vld [vmem:[#allocation2 + $0x38] sm:$0xff]  ;;  %v107_v7 = vld [vmem:[#allocation2 + $0x68] sm:$0xff]  ;;  %v116_v8 = vld [vmem:[#allocation2 + $0x80] sm:$0xff]  ;;  %v189_v13 = vsub.f32 %v104_v1, %v122_v3 }
  0x20   :  { %s791_s22 = sld [smem:[#allocation6 + $0x1]]  ;;  %v101_v9 = vld [vmem:[#allocation2 + $0x40] sm:$0xff]  ;;  %v110_v10 = vld [vmem:[#allocation2 + $0x70] sm:$0xff]  ;;  %v119_v11 = vld [vmem:[#allocation2 + $0x88] sm:$0xff]  ;;  %v170_v16 = vsub.f32 %v68_v4, %v107_v7  ;;  %v173_v17 = vsub.f32 %v98_v6, %v116_v8  ;;  %v754_v8 = vmov 683565275  }
  0x21   :  { %s793_s23 = sld [smem:[#allocation6 + $0x3]]  ;;  %v801_v18 = vld [vmem:[#allocation2 + $0x18] sm:$0xff]  ;;  %v803_v19 = vld [vmem:[#allocation2 + $0x28] sm:$0xff]  ;;  %v178_v22 = vsub.f32 %v71_v5, %v110_v10  ;;  %v181_v23 = vsub.f32 %v101_v9, %v119_v11  ;;  %v807_v24 = vld [vmem:[#allocation2 + $0x20] sm:$0xff]  ;;  %v755_v10 = vmov 2475754826  }
  0x22   :  { %s795_s24 = sld [smem:[#allocation6 + $0x4]]  ;;  %v811_v29 = vld [vmem:[#allocation2 + $0xb0] sm:$0xff]  ;;  %v817_v33 = vmul.f32 %v803_v19, %v803_v19  ;;  %v821_v34 = vmul.f32 %v803_v19, %v801_v18  ;;  %v829_v38 = vmul.f32 %v807_v24, %v807_v24  ;;  %v837_v41 = vmul.f32 %v807_v24, %v801_v18  ;;  %v125_v50 = vld [vmem:[#allocation2 + $0x98] sm:$0xff]  ;;  %v128_v51 = vld [vmem:[#allocation2 + $0xa0] sm:$0xff] }
  0x23   :  { %s797_s25 = sld [smem:[#allocation6 + $0x6]]  ;;  %v171_v20 = vstv %s785_s20  ;;  %v813_v30 = vld [vmem:[#allocation2 + $0x30] sm:$0xff]  ;;  %v229_v42 = vand.u32 2139095040, %v811_v29  ;;  %v226_v44 = vand.u32 2147483647, %v811_v29  ;;  %v131_v55 = vld [vmem:[#allocation2 + $0xa8] sm:$0xff]  ;;  %vm318_vm11 = vweird.f32 %v811_v29 }
  0x24   :  { %v187_v14 = vstv %s787_s21  ;;  %v172_v31 = vmul.f32 %v171_v20, %v170_v16  ;;  %v825_v37 = vmul.f32 %v813_v30, %v807_v24  ;;  %v833_v40 = vmul.f32 %v813_v30, %v803_v19  ;;  %s948_s26 = sld [smem:[#allocation6 + $0x7]]  ;;  %s760_s21 = smov [#allocation7]  }
  0x25   :  { %v190_v15 = vstv %s789_s0  ;;  %v188_v27 = vmul.f32 %v187_v14, %v186_v12  ;;  %v223_v45 = vadd.f32 %v829_v38, %v817_v33  ;;  %v230_v46 = vshrl.u32 %v229_v42, 23  ;;  %s952_s27 = sld [smem:[#allocation6 + $0x8]]  ;;  %s590_s0 = sshll.u32 %s760_s21, 4  ;;  %s591_s0 = int_to_ptr.vmem [resolvable:$true] %s590_s0 }
  0x26   :  { %v179_v25 = vstv %s791_s22  ;;  %v191_v28 = vmul.f32 %v190_v15, %v189_v13  ;;  %v207_v49 = vadd.f32 %v821_v34, %v825_v37  ;;  %v217_v53 = vsub.f32 %v833_v40, %v837_v41  ;;  %s962_s28 = sld [smem:[#allocation6 + $0x9]]  ;;  %s724_s22 = scalar_lea.vmem %s591_s0, 512 }
  0x27   :  { %v174_v21 = vstv %s793_s23  ;;  %v180_v35 = vmul.f32 %v179_v25, %v178_v22  ;;  %v657_v54 = vadd.s32 4294967169, %v230_v46  ;;  %v233_v56 = vand.u32 8388607, %v226_v44  ;;  %s968_s29 = sld [smem:[#allocation6 + $0xa]]  ;;  %p725_p10 = scmp.ne.s32.totalorder %s591_s0, %s724_s22 }
  0x28   :  { %v182_v26 = vstv %s795_s24  ;;  %v175_v32 = vmul.f32 %v174_v21, %v173_v17  ;;  %v192_v39 = vadd.f32 %v191_v28, %v188_v27  ;;  %v224_v57 = vmul.f32 2.0, %v223_v45  ;;  %s976_s30 = sld [smem:[#allocation6 + $0xb]]  ;;  %p729_p11 = scmp.lt.s32.totalorder %s591_s0, %s591_s0 }
  0x29   :  { %v183_v36 = vmul.f32 %v182_v26, %v181_v23  ;;  %v193_v43 = vstv %s797_s25  ;;  %v236_v58 = vadd.s32 1, %v657_v54  ;;  %v854_v61 = vmul.f32 2.0, %v207_v49  ;;  %s983_s3 = sld [smem:[#allocation6 + $0xc]]  ;;  %p730_p12 = scmp.lt.s32.totalorder %s724_s22, %s724_s22 }
  0x2a   :  { %v176_v47 = vadd.f32 %v175_v32, %v172_v31  ;;  %v194_v52 = vsub.f32 %v192_v39, %v193_v43  ;;  %v858_v63 = vmul.f32 2.0, %v217_v53  ;;  %v234_v0 = vor.u32 8388608, %v233_v56  ;;  %s989_s4 = sld [smem:[#allocation6 + $0xd]] }
  0x2b   :  { %v184_v48 = vadd.f32 %v183_v36, %v180_v35  ;;  %vm237_vm0 = vcmp.gt.s32.totalorder %v236_v58, 0  ;;  %v860_v2 = vsub.f32 1.0, %v224_v57  ;;  %v756_v12 = vmov 2131351028   ;;  %s991_s5 = sld [smem:[#allocation6 + $0xe]]  ;;  %p731_p13 = por %p730_p12, %p729_p11 }
  0x2c   :  { %v850_v59 = vsub.f32 %v176_v47, %v125_v50  ;;  %v856_v62 = vsub.f32 %v194_v52, %v131_v55  ;;  %v238_v1 = vsel %vm237_vm0, %v236_v58, 0  ;;  %v757_v14 = vmov 2102212464   ;;  %s997_s6 = sld [smem:[#allocation6 + $0xf]] }
  0x2d   :  { %v852_v60 = vsub.f32 %v184_v48, %v128_v51  ;;  %v240_v3 = vand.u32 31, %v238_v1  ;;  %v239_v4 = vshrl.u32 %v238_v1, 5  ;;  %v758_v16 = vmov 920167782   ;;  %s1004_s7 = sld [smem:[#allocation6 + $0x10]]  ;;  %p732_p0 = pnand %p731_p13, %p725_p10 }
  0x2e   :  { %v525_v5 = vmul.f32 %v854_v61, %v850_v59  ;;  %v274_v20 = vshll.u32 %v234_v0, 8  ;;  %v528_v21 = vmul.f32 %v860_v2, %v856_v62  ;;  %v759_v28 = vmov 1326507024   ;;  %s1007_s8 = sld [smem:[#allocation6 + $0x11]] }
  0x2f   :  { %v526_v6 = vmul.f32 %v858_v63, %v852_v60  ;;  %v241_v7 = vsub.s32 32, %v240_v3  ;;  %v243_v9 = vshll.u32 %v754_v8, %v240_v3  ;;  %v246_v11 = vshll.u32 %v755_v10, %v240_v3  ;;  %s1013_s9 = sld [smem:[#allocation6 + $0x12]] }
  0x30   :  { %v249_v13 = vshll.u32 %v756_v12, %v240_v3  ;;  %v252_v15 = vshll.u32 %v757_v14, %v240_v3  ;;  %v255_v17 = vshll.u32 %v758_v16, %v240_v3  ;;  %vm258_vm1 = vcmp.lt.s32.totalorder %v239_v4, 1  ;;  %s1019_s10 = sld [smem:[#allocation6 + $0x13]] }
  0x31   :  { %v242_v22 = vshrl.u32 %v754_v8, %v241_v7  ;;  %v244_v23 = vshrl.u32 %v755_v10, %v241_v7  ;;  %v247_v25 = vshrl.u32 %v756_v12, %v241_v7  ;;  %v250_v26 = vshrl.u32 %v757_v14, %v241_v7  ;;  %s1022_s11 = sld [smem:[#allocation6 + $0x14]] }
  0x32   :  { %v253_v27 = vshrl.u32 %v758_v16, %v241_v7  ;;  %v256_v31 = vshrl.u32 %v759_v28, %v241_v7  ;;  %vm261_vm2 = vcmp.lt.s32.totalorder %v239_v4, 4  ;;  %v527_v39 = vadd.f32 %v526_v6, %v525_v5  ;;  %s1024_s12 = sld [smem:[#allocation6 + $0x15]] }
  0x33   :  { %v245_v32 = vor.u32 %v244_v23, %v243_v9  ;;  %v248_v35 = vor.u32 %v247_v25, %v246_v11  ;;  %v251_v36 = vor.u32 %v250_v26, %v249_v13  ;;  %vm259_vm3 = vcmp.lt.s32.totalorder %v239_v4, 2  ;;  %s1031_s13 = sld [smem:[#allocation6 + $0x16]] }
  0x34   :  { %v254_v42 = vor.u32 %v253_v27, %v252_v15  ;;  %v257_v43 = vor.u32 %v256_v31, %v255_v17  ;;  %vm260_vm4 = vcmp.lt.s32.totalorder %v239_v4, 3  ;;  %v868_v52 = vadd.f32 %v528_v21, %v527_v39  ;;  %s1035_s14 = sld [smem:[#allocation6 + $0x17]] }
  0x35   :  { %v262_v45 = vsel %vm258_vm1, %v242_v22, %v245_v32  ;;  %v263_v46 = vsel %vm261_vm2, %v251_v36, 2102212464  ;;  %v266_v47 = vsel %vm258_vm1, %v245_v32, %v248_v35  ;;  %v270_v48 = vsel %vm258_vm1, %v248_v35, %v251_v36  ;;  %s1037_s17 = sld [smem:[#allocation6 + $0x19]] }
  0x36   :  { %v264_v49 = vsel %vm260_vm4, %v248_v35, %v263_v46  ;;  %v267_v50 = vsel %vm261_vm2, %v254_v42, 920167782  ;;  %v271_v51 = vsel %vm261_vm2, %v257_v43, 1326507024  ;;  %v433_v16 = vmul.f32 %v850_v59, %v850_v59  ;;  %s1039_s18 = sld [smem:[#allocation6 + $0x1a]] }
  0x37   :  { %v268_v53 = vsel %vm260_vm4, %v251_v36, %v267_v50  ;;  %v272_v54 = vsel %vm260_vm4, %v254_v42, %v271_v51  ;;  %v265_v55 = vsel %vm259_vm3, %v262_v45, %v264_v49  ;;  %v434_v17 = vmul.f32 %v852_v60, %v852_v60  ;;  %s1042_s19 = sld [smem:[#allocation6 + $0x1b]] }
  0x38   :  { %v269_v56 = vsel %vm259_vm3, %v266_v47, %v268_v53  ;;  %v273_v57 = vsel %vm259_vm3, %v270_v48, %v272_v54  ;;  %v281_v4 = vmul.u32 %v274_v20, %v265_v55  ;;  %v436_v22 = vmul.f32 %v856_v62, %v856_v62  ;;  %s1046_s1 = sld [smem:[#allocation6 + $0x18]] }
  0x39   :  { %v870_v58 = vmul.u32.u64.low %v274_v20, %v273_v57  ;;  %v871_v0 = vmul.u32.u64.high %v274_v20, %v273_v57, %v870_v58  ;;  %v873_v1 = vmul.u32.u64.low %v274_v20, %v269_v56  ;;  %v874_v3 = vmul.u32.u64.high %v274_v20, %v269_v56, %v873_v1  ;;  %s1049_s20 = sld [smem:[#allocation6 + $0x1c]] }
  0x3a   :  { %v435_v27 = vadd.f32 %v434_v17, %v433_v16  ;;  %vm228_vm7 = vcmp.lt.s32.totalorder %v811_v29, 0  ;;  %vm227_vm8 = vcmp.le.f32.partialorder %v226_v44, 0.7853982  ;;  %v444_v55 = vsub.f32 0.0, %v856_v62 }
  0x3b   :  { %vm283_vm5 = vc.u32 %v871_v0, %v873_v1  ;;  %v284_v5 = vadd.s32 1, %v874_v3  ;;  %v282_v20 = vadd.s32 %v873_v1, %v871_v0  ;;  %v440_v0 = vsub.f32 0.0, %v850_v59 }
  0x3c   :  { %v437_v36 = vadd.f32 %v436_v22, %v435_v27  ;;  %v442_v1 = vsub.f32 0.0, %v852_v60  ;;  %v201_v27 = vmul.f32 %v803_v19, %v807_v24 }
  0x3d   :  { %v285_v6 = vsel %vm283_vm5, %v284_v5, %v874_v3 }
  0x3e   :  { %v286_v7 = vadd.s32 %v285_v6, %v281_v4  ;;  %v438_v45 = vmax.f32 %v437_v36, 1e-24  ;;  %v89_v36 = vld [vmem:[#allocation2 + $0x50] sm:$0xff] }
  0x40   :  { %v287_v8 = vadd.s32 536870912, %v286_v7  ;;  %684 = vrsqrt.f32 %v438_v45 }
  0x42   :  { %v288_v9 = vshrl.u32 %v287_v8, 30 }
  0x44   :  { %v289_v10 = vshll.u32 %v288_v9, 30  ;;  %v312_v47 = vsub.s32 4, %v288_v9 }
  0x46   :  { %v290_v11 = vsub.s32 %v286_v7, %v289_v10  ;;  %v313_v50 = vsel %vm228_vm7, %v312_v47, %v288_v9 }
  0x47   :  { %v315_v53 = vsel %vm227_vm8, 0, %v313_v50  ;;  %v141_v50 = vmul.f32 %v89_v36, %v813_v30 }
  0x48   :  { %v292_v12 = vsub.s32 0, %v290_v11  ;;  %v422_v54 = vadd.s32 3, %v315_v53  ;;  %v319_v57 = vand.u32 3, %v315_v53  ;;  %v147_v53 = vmul.f32 %v89_v36, %v807_v24 }
  0x4a   :  { %v658_v13 = vmin.u32 %v292_v12, %v290_v11  ;;  %v423_v58 = vand.u32 3, %v422_v54  ;;  %vm324_vm9 = vcmp.eq.s32.totalorder %v319_v57, 2  ;;  %vm321_vm12 = vcmp.eq.s32.totalorder %v319_v57, 0 }
  0x4b   :  { %vm320_vm14 = vcmp.lt.s32.totalorder %v319_v57, 2 }
  0x4c   :  { %v294_v14 = vclz %v658_v13  ;;  %vm428_vm10 = vcmp.eq.s32.totalorder %v423_v58, 2  ;;  %vm425_vm13 = vcmp.eq.s32.totalorder %v423_v58, 0  ;;  %vm424_vm15 = vcmp.lt.s32.totalorder %v423_v58, 2 }
  0x4d   :  { %v685_v56 = vpop.eup %684 }
  0x4e   :  { %v659_v15 = vadd.s32 4294967294, %v294_v14  ;;  %v893_v44 = vmul.f32 %v685_v56, %v444_v55  ;;  %v896_v6 = vmul.f32 %v685_v56, %v440_v0  ;;  %v898_v8 = vmul.f32 %v685_v56, %v442_v1 }
  0x4f   :  { %v145_v55 = vmul.f32 %v89_v36, %v803_v19  ;;  %v221_v0 = vadd.f32 %v837_v41, %v833_v40 }
  0x50   :  { %vm660_vm6 = vcmp.lt.s32.totalorder %v659_v15, 0  ;;  %v446_v60 = vsub.f32 0.0, %v893_v44 }
  0x51   :  { %v297_v21 = vsel %vm660_vm6, 0, %v659_v15 }
  0x52   :  { %v298_v23 = vsub.s32 32, %v297_v21  ;;  %v299_v25 = vshll.u32 %v290_v11, %v297_v21  ;;  %v302_v26 = vsub.s32 4294967266, %v297_v21  ;;  %v197_v21 = vmul.f32 %v813_v30, %v813_v30 }
  0x54   :  { %v300_v28 = vshrl.u32 %v282_v20, %v298_v23  ;;  %v303_v31 = vadd.s32 127, %v302_v26  ;;  %v198_v45 = vadd.f32 %v197_v21, %v817_v33 }
  0x56   :  { %v301_v32 = vor.u32 %v300_v28, %v299_v25  ;;  %v304_v35 = vshll.u32 %v303_v31, 23  ;;  %v202_v28 = vmul.f32 %v813_v30, %v801_v18  ;;  %v212_v31 = vadd.f32 %v829_v38, %v197_v21 }
  0x57   :  { %v940_v57 = vmul.f32 2.0, %v198_v45 }
  0x58   :  { %v305_v39 = vor.u32 4788187, %v304_v35  ;;  %v308_v42 = vcvt.s32.f32 %v301_v32  ;;  %v135_v32 = vmul.f32 2.0, %v801_v18  ;;  %v929_v47 = vmul.f32 2.0, %v212_v31 }
  0x59   :  { %v209_v56 = vadd.f32 %v202_v28, %v201_v27 }
  0x5a   :  { %v306_v43 = vand.u32 2147483647, %v305_v39  ;;  %v92_v39 = vld [vmem:[#allocation2 + $0x58] sm:$0xff]  ;;  %v214_v58 = vsub.f32 1.0, %v929_v47 }
  0x5b   :  { %v148_v54 = vmul.f32 %v92_v39, %v803_v19  ;;  %v144_v33 = vmul.f32 %v92_v39, %v807_v24 }
  0x5c   :  { %v309_v46 = vmul.f32 %v308_v42, %v306_v43  ;;  %v95_v42 = vld [vmem:[#allocation2 + $0x60] sm:$0xff]  ;;  %v472_v41 = vmul.f32 %v898_v8, %v214_v58 }
  0x5d   :  { %v138_v38 = vmul.f32 %v95_v42, %v803_v19 }
  0x5e   :  { %v310_v48 = vxor.u32 2147483648, %v309_v46 }
  0x60   :  { %v311_v49 = vsel %vm228_vm7, %v310_v48, %v309_v46  ;;  %v203_v46 = vsub.f32 %v201_v27, %v202_v28  ;;  %v136_v48 = vmul.f32 %v135_v32, %v801_v18 }
  0x61   :  { %v314_v51 = vsel %vm227_vm8, %v811_v29, %v311_v49  ;;  %v139_v49 = vmul.f32 %v92_v39, %v813_v30 }
  0x62   :  { %686 = vcosq.f32 %v314_v51  ;;  %v942_v18 = vmul.f32 2.0, %v203_v46  ;;  %v656_v1 = vadd.f32 -1.0, %v136_v48 }
  0x63   :  { %688 = vsinq.f32 %v314_v51  ;;  %v142_v51 = vmul.f32 %v95_v42, %v807_v24 }
  0x64   :  { %v471_v40 = vmul.f32 %v896_v6, %v942_v18 }
  0x6f   :  { %v687_v3 = vpop.eup %686 }
  0x70   :  { %v689_v4 = vpop.eup %688  ;;  %v325_v5 = vxor.u32 2147483648, %v687_v3 }
  0x71   :  { %v322_v62 = vxor.u32 2147483648, %v689_v4 }
  0x72   :  { %v326_v7 = vsel %vm324_vm9, %v325_v5, %v689_v4  ;;  %v430_v59 = vsel %vm428_vm10, %v325_v5, %v689_v4  ;;  %v143_v4 = vsub.f32 %v141_v50, %v142_v51  ;;  %v149_v5 = vadd.f32 %v148_v54, %v147_v53 }
  0x73   :  { %v323_v9 = vsel %vm321_vm12, %v687_v3, %v322_v62  ;;  %v427_v10 = vsel %vm425_vm13, %v687_v3, %v322_v62  ;;  %v140_v3 = vsub.f32 %v138_v38, %v139_v49  ;;  %v150_v62 = vmul.f32 %v95_v42, %v813_v30 }
  0x74   :  { %v327_v11 = vsel %vm320_vm14, %v323_v9, %v326_v7  ;;  %v431_v12 = vsel %vm424_vm15, %v427_v10, %v430_v59  ;;  %v146_v7 = vsub.f32 %v144_v33, %v145_v55  ;;  %v210_v59 = vmul.f32 2.0, %v209_v56 }
  0x75   :  { %v328_v13 = vsel %vm318_vm11, nan, %v327_v11  ;;  %v432_v14 = vsel %vm318_vm11, nan, %v431_v12  ;;  %v200_v9 = vsub.f32 1.0, %v940_v57  ;;  %v955_v10 = vmul.f32 2.0, %v221_v0 }
  0x76   :  { %v905_v15 = vmul.f32 %v446_v60, %v432_v14  ;;  %v908_v16 = vmul.f32 %v893_v44, %v328_v13  ;;  %v449_v17 = vmul.f32 %v896_v6, %v432_v14  ;;  %v450_v20 = vmul.f32 %v898_v8, %v328_v13 }
  0x77   :  { %v219_v60 = vsub.f32 %v825_v37, %v821_v34  ;;  %v964_v11 = vmul.f32 %v656_v1, %v89_v36  ;;  %v155_v12 = vmul.f32 2.0, %v807_v24  ;;  %v161_v34 = vmul.f32 2.0, %v803_v19 }
  0x78   :  { %v914_v22 = vsub.f32 %v449_v17, %v450_v20  ;;  %v452_v23 = vmul.f32 %v905_v15, %v905_v15  ;;  %v453_v29 = vmul.f32 %v908_v16, %v908_v16  ;;  %v151_v37 = vadd.f32 %v150_v62, %v149_v5 }
  0x79   :  { %v970_v13 = vmul.f32 %v140_v3, %v135_v32  ;;  %v972_v14 = vmul.f32 %v656_v1, %v92_v39  ;;  %v974_v17 = vmul.f32 %v143_v4, %v135_v32  ;;  %v978_v20 = vmul.f32 %v656_v1, %v95_v42 }
  0x7a   :  { %v454_v25 = vadd.f32 %v453_v29, %v452_v23  ;;  %v455_v26 = vmul.f32 %v914_v22, %v914_v22  ;;  %v980_v21 = vmul.f32 %v146_v7, %v135_v32  ;;  %v167_v23 = vmul.f32 2.0, %v813_v30 }
  0x7b   :  { %v220_v24 = vmul.f32 2.0, %v219_v60  ;;  %v473_v19 = vadd.f32 %v472_v41, %v471_v40  ;;  %v474_v29 = vmul.f32 %v893_v44, %v955_v10  ;;  %v154_v28 = vsub.f32 %v964_v11, %v970_v13 }
  0x7c   :  { %v456_v35 = vadd.f32 %v455_v26, %v454_v25  ;;  %v486_v25 = vmul.f32 %v896_v6, %v200_v9  ;;  %v487_v26 = vmul.f32 %v898_v8, %v210_v59  ;;  %v156_v30 = vmul.f32 %v155_v12, %v151_v37 }
  0x7d   :  { %v160_v31 = vsub.f32 %v972_v14, %v974_v17  ;;  %v162_v32 = vmul.f32 %v161_v34, %v151_v37  ;;  %v475_v45 = vadd.f32 %v474_v29, %v473_v19  ;;  %v489_v48 = vmul.f32 %v893_v44, %v220_v24 }
  0x7e   :  { %v457_v43 = vmax.f32 %v456_v35, 1e-24  ;;  %v166_v35 = vsub.f32 %v978_v20, %v980_v21  ;;  %v488_v46 = vadd.f32 %v487_v26, %v486_v25  ;;  %v157_v47 = vadd.f32 %v156_v30, %v154_v28 }
  0x7f   :  { %v510_v41 = vstv %s968_s29  ;;  %v516_v12 = vstv %s976_s30  ;;  %v522_v34 = vstv %s983_s3  ;;  %v508_v14 = vstv %s948_s26 }
  0x80   :  { %690 = vrsqrt.f32 %v457_v43  ;;  %v168_v43 = vmul.f32 %v167_v23, %v151_v37  ;;  %v511_v20 = vmul.f32 %v510_v41, %v157_v47  ;;  %v514_v21 = vstv %s952_s27 }
  0x81   :  { %v520_v23 = vstv %s962_s28  ;;  %v532_v28 = vstv %s991_s5  ;;  %v535_v30 = vstv %s997_s6 }
  0x8d   :  { %v691_v27 = vpop.eup %690 }
  0x8e   :  { %v459_v36 = vmul.f32 %v691_v27, %v905_v15  ;;  %v460_v39 = vmul.f32 %v691_v27, %v908_v16  ;;  %v461_v42 = vmul.f32 %v691_v27, %v914_v22  ;;  %v530_v27 = vstv %s989_s4 }
  0x90   :  { %v462_v49 = vmul.f32 %v460_v39, %v893_v44  ;;  %v463_v50 = vmul.f32 %v461_v42, %v898_v8  ;;  %v465_v38 = vmul.f32 %v461_v42, %v896_v6  ;;  %v466_v15 = vmul.f32 %v459_v36, %v893_v44 }
  0x91   :  { %v468_v16 = vmul.f32 %v459_v36, %v898_v8  ;;  %v469_v22 = vmul.f32 %v460_v39, %v896_v6  ;;  %v476_v51 = vmul.f32 %v459_v36, %v854_v61  ;;  %v477_v53 = vmul.f32 %v460_v39, %v858_v63 }
  0x92   :  { %v464_v54 = vsub.f32 %v462_v49, %v463_v50  ;;  %v467_v33 = vsub.f32 %v465_v38, %v466_v15  ;;  %v479_v55 = vmul.f32 %v461_v42, %v860_v2  ;;  %v491_v56 = vmul.f32 %v459_v36, %v200_v9 }
  0x93   :  { %v470_v44 = vsub.f32 %v468_v16, %v469_v22  ;;  %v478_v57 = vadd.f32 %v477_v53, %v476_v51  ;;  %v492_v0 = vmul.f32 %v460_v39, %v210_v59  ;;  %v494_v1 = vmul.f32 %v461_v42, %v220_v24 }
  0x94   :  { %v481_v6 = vmul.f32 %v464_v54, %v854_v61  ;;  %v482_v8 = vmul.f32 %v467_v33, %v858_v63  ;;  %v496_v3 = vmul.f32 %v464_v54, %v942_v18  ;;  %v497_v4 = vmul.f32 %v467_v33, %v214_v58 }
  0x95   :  { %v480_v5 = vadd.f32 %v479_v55, %v478_v57  ;;  %v484_v62 = vmul.f32 %v470_v44, %v860_v2  ;;  %v493_v7 = vadd.f32 %v492_v0, %v491_v56  ;;  %v499_v59 = vmul.f32 %v470_v44, %v955_v10 }
  0x96   :  { %v483_v61 = vadd.f32 %v482_v8, %v481_v6  ;;  %v490_v63 = vadd.f32 %v489_v48, %v488_v46  ;;  %v498_v60 = vadd.f32 %v497_v4, %v496_v3  ;;  %v163_v18 = vadd.f32 %v162_v32, %v160_v31 }
  0x97   :  { %v495_v58 = vadd.f32 %v494_v1, %v493_v7  ;;  %v501_v9 = vsub.f32 %v475_v45, %v480_v5  ;;  %v169_v2 = vadd.f32 %v168_v43, %v166_v35  ;;  %v538_v35 = vstv %s1004_s7 }
  0x98   :  { %v485_v10 = vadd.f32 %v484_v62, %v483_v61  ;;  %v500_v40 = vadd.f32 %v499_v59, %v498_v60  ;;  %v517_v29 = vmul.f32 %v516_v12, %v163_v18  ;;  %v543_v36 = vstv %s1007_s8 }
  0x99   :  { %v502_v11 = vmul.f32 0.5, %v501_v9  ;;  %v523_v25 = vmul.f32 %v522_v34, %v169_v2  ;;  %v545_v42 = vstv %s1013_s9  ;;  %v548_v43 = vstv %s1019_s10 }
  0x9a   :  { %v503_v37 = vsub.f32 %v485_v10, %v490_v63  ;;  %v505_v13 = vsub.f32 %v495_v58, %v500_v40  ;;  %v551_v45 = vstv %s1022_s11  ;;  %v557_v49 = vstv %s1024_s12 }
  0x9b   :  { %v507_v17 = vsub.f32 0.0, %v502_v11  ;;  %v571_v50 = vstv %s1037_s17  ;;  %v559_v38 = vstv %s1031_s13  ;;  %v562_v15 = vstv %s1035_s14 }
  0x9c   :  { %v504_v24 = vmul.f32 0.5, %v503_v37  ;;  %v506_v19 = vmul.f32 0.5, %v505_v13  ;;  %v573_v16 = vstv %s1039_s18  ;;  %v576_v22 = vstv %s1042_s19 }
  0x9d   :  { %v509_v26 = vmul.f32 %v508_v14, %v507_v17  ;;  %v565_v56 = vstv %s1046_s1  ;;  %v579_v57 = vstv %s1049_s20  ;;  %v539_v59 = vmul.f32 %v538_v35, %v868_v52 }
  0x9e   :  { %v513_v31 = vsub.f32 0.0, %v504_v24  ;;  %v519_v32 = vsub.f32 0.0, %v506_v19  ;;  %v552_v63 = vmul.f32 %v551_v45, %v868_v52  ;;  %v566_v47 = vmul.f32 %v565_v56, %v868_v52 }
  0x9f   :  { %v512_v39 = vsub.f32 %v509_v26, %v511_v20  ;;  %v580_v58 = vmul.f32 %v579_v57, %v868_v52 }
  0xa0   :  { %v515_v46 = vmul.f32 %v514_v21, %v513_v31  ;;  %v521_v48 = vmul.f32 %v520_v23, %v519_v32 }
  0xa1   :  { %v531_v54 = vmul.f32 %v530_v27, %v512_v39  ;;  %v544_v33 = vmul.f32 %v543_v36, %v512_v39  ;;  %v558_v55 = vmul.f32 %v557_v49, %v512_v39  ;;  %v572_v44 = vmul.f32 %v571_v50, %v512_v39 }
  0xa2   :  { %v518_v51 = vsub.f32 %v515_v46, %v517_v29  ;;  %v524_v53 = vsub.f32 %v521_v48, %v523_v25 }
  0xa4   :  { %v533_v0 = vmul.f32 %v532_v28, %v518_v51  ;;  %v536_v1 = vmul.f32 %v535_v30, %v524_v53  ;;  %v546_v6 = vmul.f32 %v545_v42, %v518_v51  ;;  %v549_v8 = vmul.f32 %v548_v43, %v524_v53 }
  0xa5   :  { %v560_v3 = vmul.f32 %v559_v38, %v518_v51  ;;  %v563_v4 = vmul.f32 %v562_v15, %v524_v53  ;;  %v574_v5 = vmul.f32 %v573_v16, %v518_v51  ;;  %v577_v62 = vmul.f32 %v576_v22, %v524_v53 }
  0xa6   :  { %v534_v7 = vadd.f32 %v533_v0, %v531_v54  ;;  %v547_v61 = vadd.f32 %v546_v6, %v544_v33 }
  0xa7   :  { %v561_v60 = vadd.f32 %v560_v3, %v558_v55  ;;  %v575_v18 = vadd.f32 %v574_v5, %v572_v44 }
  0xa8   :  { %v537_v9 = vadd.f32 %v536_v1, %v534_v7  ;;  %v550_v2 = vadd.f32 %v549_v8, %v547_v61 }
  0xa9   :  { %v564_v10 = vadd.f32 %v563_v4, %v561_v60  ;;  %v578_v40 = vadd.f32 %v577_v62, %v575_v18 }
  0xaa   :  { %v540_v41 = vadd.f32 %v539_v59, %v537_v9  ;;  %v553_v11 = vadd.f32 %v552_v63, %v550_v2 }
  0xab   :  { %v567_v12 = vadd.f32 %v566_v47, %v564_v10  ;;  %v581_v34 = vadd.f32 %v580_v58, %v578_v40 }
  0xac   :  { %v665_v37 = vadd.f32 -1.0, %v540_v41  ;;  %v666_v13 = vadd.f32 -1.0, %v553_v11 }
  0xad   :  { %v667_v14 = vadd.f32 -1.0, %v567_v12  ;;  %v668_v17 = vadd.f32 -1.0, %v581_v34 }
  0xae   :  { %542 = vst [vmem:[#allocation7] sm:$0xff] %v665_v37  ;;  %556 = vst [vmem:[#allocation7 + $0x8] sm:$0xff] %v666_v13 }
  0xaf   :  { %570 = vst [vmem:[#allocation7 + $0x10] sm:$0xff] %v667_v14  ;;  %584 = vst [vmem:[#allocation7 + $0x18] sm:$0xff] %v668_v17 }
  0xb0   :  { %735 = shalt.err (!%p732_p0)
}
  0xb1   :  { %596 = dma.vmem_to_hbm [thread:$0]  %s591_s0, 512, %s1081_s2, [#allocation4], %s751_s15, %s751_s15, %s752_s16  }
  0xb2   :  { %748 = dma.done.wait [#allocation4], 512  }
  0xb3   :  { %749 = vsyncadd [#allocation4], 4294966784 }
  0xb4   :  { %600 = vsyncpa [#allocation3], 1 }
  0xb5   :  { %601 = vsyncpa [#allocation4], 1 }
  0xb6   :  { %602 = vsyncpa [#allocation5], 1 }

</bundles_post_ra>
